<compile_context>
chip_gen: v7x
topology: tpu7x:2x2x1
jax: 0.10.0
libtpu: 0.0.40
codegen_flags: <defaults>
</compile_context>

<pallas_src>
import math

import jax
import jax.numpy as jnp
import numpy as np
from jax.experimental import pallas as pl
from jax.experimental.pallas import tpu as pltpu

HEAD_SIZE = 8  # MultiHeadAttention default head_size=8
EPS = 1e-6     # LayerNorm eps


def _layernorm(v, g, b):
    mu = jnp.mean(v, axis=-1, keepdims=True)
    var = jnp.mean((v - mu) ** 2, axis=-1, keepdims=True)
    return (v - mu) * jax.lax.rsqrt(var + EPS) * g + b


def decoder_layer_kernel(
    x_ref, mask_ref,
    ln1_g_ref, ln1_b_ref,
    wq_ref, wk_ref, wv_ref, wo_ref,
    ln2_g_ref, ln2_b_ref,
    w1_ref, b1_ref, w2_ref, b2_ref,
    out_ref,
):
    x = x_ref[...]                       # (B*S, H) f32, lane-dense slab
    BS, H = x.shape
    B, S, _ = mask_ref.shape
    NH = HEAD_SIZE
    dk = H // NH

    # masked_fill mask, broadcast over heads once per call (grid is a single step).
    mask = mask_ref[...]                 # (B, S, S) int32, 1 = masked
    mask_n = jnp.broadcast_to(mask[:, None, :, :], (B, NH, S, S)).reshape(B * NH, S, S)

    # ---- self-attention sub-block (pre-norm) ----
    y = _layernorm(x, ln1_g_ref[...], ln1_b_ref[...])                      # (B*S, H)

    # Fused full-width projections (1/sqrt(dk) already folded into Wq).
    q = jnp.dot(y, wq_ref[...], preferred_element_type=jnp.float32)       # (B*S, H)
    k = jnp.dot(y, wk_ref[...], preferred_element_type=jnp.float32)
    v = jnp.dot(y, wv_ref[...], preferred_element_type=jnp.float32)

    def to_heads(t):                     # (B*S, H) -> (B*HEAD, S, dk)
        return t.reshape(B, S, NH, dk).transpose(0, 2, 1, 3).reshape(B * NH, S, dk)

    qh, kh, vh = to_heads(q), to_heads(k), to_heads(v)

    # Scores: contract dk directly (no materialized K transpose), one batch dim n=B*HEAD.
    s = jnp.einsum("nqd,nkd->nqk", qh, kh, preferred_element_type=jnp.float32)
    s = jnp.where(mask_n != 0, -1e9, s)                                    # masked_fill
    s = s - jnp.max(s, axis=-1, keepdims=True)
    p = jnp.exp(s)
    p = p * pl.reciprocal(jnp.sum(p, axis=-1, keepdims=True), approx=True)  # EUP divide

    ctx = jnp.einsum("nqk,nkd->nqd", p, vh, preferred_element_type=jnp.float32)
    ctx = ctx.reshape(B, NH, S, dk).transpose(0, 2, 1, 3).reshape(BS, H)   # back to (B*S, H)

    x1 = x + jnp.dot(ctx, wo_ref[...], preferred_element_type=jnp.float32)  # residual 1

    # ---- feed-forward sub-block (pre-norm) ----
    y2 = _layernorm(x1, ln2_g_ref[...], ln2_b_ref[...])
    h1 = jnp.dot(y2, w1_ref[...], preferred_element_type=jnp.float32) + b1_ref[...]
    h1 = jnp.maximum(h1, 0.0)
    ffn = jnp.dot(h1, w2_ref[...], preferred_element_type=jnp.float32) + b2_ref[...]
    out_ref[...] = x1 + ffn              # residual 2 (dropouts are identity in eval mode)


def decoder_layer(x, mask_i32, kp):
    """x: (B, S, H) f32; mask_i32: (B, S, S) int32 (1 = masked)."""
    B, S, H = x.shape
    F = kp["w1"].shape[1]
    x2d = x.reshape(B * S, H)            # lane-dense 2-D slab for input & output

    def cspec(shape):
        zeros = (0,) * len(shape)
        return pl.BlockSpec(shape, lambda i, _z=zeros: _z)

    out2d = pl.pallas_call(
        decoder_layer_kernel,
        out_shape=jax.ShapeDtypeStruct((B * S, H), jnp.float32),
        grid=(1,),                       # single fat step: whole batch at once
        in_specs=[
            cspec((B * S, H)),           # x slab
            cspec((B, S, S)),            # mask (int32, 1 = masked)
            cspec((1, H)), cspec((1, H)),            # ln1 gamma / beta
            cspec((H, H)), cspec((H, H)),            # Wq (scale folded), Wk
            cspec((H, H)), cspec((H, H)),            # Wv, Wo
            cspec((1, H)), cspec((1, H)),            # ln2 gamma / beta
            cspec((H, F)), cspec((1, F)),            # W1, b1
            cspec((F, H)), cspec((1, H)),            # W2, b2
        ],
        out_specs=cspec((B * S, H)),
        # Single grid step -> megacore split irrelevant; keep the axis 'arbitrary'.
        compiler_params=pltpu.CompilerParams(dimension_semantics=("arbitrary",)),
    )(
        x2d, mask_i32,
        kp["ln1_g"], kp["ln1_b"],
        kp["wq"], kp["wk"], kp["wv"], kp["wo"],
        kp["ln2_g"], kp["ln2_b"],
        kp["w1"], kp["b1"], kp["w2"], kp["b2"],
    )
    return out2d.reshape(B, S, H)


# ---------------- parameters ----------------

def xavier_uniform(key, fan_in, fan_out):
    limit = math.sqrt(6.0 / (fan_in + fan_out))
    # torch stores Linear weight as (out, in); we keep it pre-transposed (in, out).
    return jax.random.uniform(key, (fan_in, fan_out), jnp.float32, -limit, limit)


def make_params(key, H, F):
    """f32 parameters, 1:1 with the PyTorch module (used by the reference)."""
    keys = jax.random.split(key, 6)
    return {
        "ln1_g": jnp.ones((1, H), jnp.float32),
        "ln1_b": jnp.zeros((1, H), jnp.float32),
        "wq": xavier_uniform(keys[0], H, H),
        "wk": xavier_uniform(keys[1], H, H),
        "wv": xavier_uniform(keys[2], H, H),
        "wo": xavier_uniform(keys[3], H, H),
        "ln2_g": jnp.ones((1, H), jnp.float32),
        "ln2_b": jnp.zeros((1, H), jnp.float32),
        "w1": xavier_uniform(keys[4], H, F),
        "b1": jnp.zeros((1, F), jnp.float32),
        "w2": xavier_uniform(keys[5], F, H),
        "b2": jnp.zeros((1, H), jnp.float32),
    }


def prepare_kernel_params(p):
    """One-time parameter prep: fold 1/sqrt(dk) into the full (H,H) Wq.
    Weights stay full-width (H,H)/(H,F)/(F,H) and f32 (no per-head split, no bf16:
    the execution backend does not support bf16 dots)."""
    H = p["wq"].shape[0]
    dk = H // HEAD_SIZE
    kp = dict(p)
    kp["wq"] = p["wq"] * (dk ** -0.5)
    return kp


# ---------------- pure-JAX reference (mirror of the PyTorch forward, eval mode) ----------------

def reference_decoder_layer(x, mask_bool, p):
    B, S, H = x.shape
    dk = H // HEAD_SIZE

    def ln(v, g, b):
        mu = jnp.mean(v, -1, keepdims=True)
        var = jnp.mean((v - mu) ** 2, -1, keepdims=True)
        return (v - mu) / jnp.sqrt(var + EPS) * g[0] + b[0]

    y = ln(x, p["ln1_g"], p["ln1_b"])
    q = (y @ p["wq"]).reshape(B, S, HEAD_SIZE, dk).transpose(0, 2, 1, 3) * dk ** -0.5
    k = (y @ p["wk"]).reshape(B, S, HEAD_SIZE, dk).transpose(0, 2, 1, 3)
    v = (y @ p["wv"]).reshape(B, S, HEAD_SIZE, dk).transpose(0, 2, 1, 3)
    s = jnp.einsum("bhqd,bhkd->bhqk", q, k)
    s = jnp.where(mask_bool[:, None, :, :], -1e9, s)
    a = jax.nn.softmax(s, axis=-1)
    ctx = jnp.einsum("bhqk,bhkd->bhqd", a, v).transpose(0, 2, 1, 3).reshape(B, S, H)
    x1 = x + ctx @ p["wo"]

    y2 = ln(x1, p["ln2_g"], p["ln2_b"])
    h1 = jnp.maximum(y2 @ p["w1"] + p["b1"][0], 0.0)
    return x1 + h1 @ p["w2"] + p["b2"][0]


if __name__ == "__main__":
    B, S, H, F = 2, 8, 32, 64  # batch, seq, hidden_size, filter_size

    key = jax.random.PRNGKey(0)
    kx, kprm = jax.random.split(key)
    x = jax.random.normal(kx, (B, S, H), jnp.float32)
    # causal mask: True above the diagonal => masked (matches torch masked_fill semantics)
    mask_bool = jnp.broadcast_to(jnp.triu(jnp.ones((S, S), bool), 1), (B, S, S))
    mask_i32 = mask_bool.astype(jnp.int32)   # compact mask input (not dense f32)

    params = make_params(kprm, H, F)
    kparams = prepare_kernel_params(params)  # one-time: fold 1/sqrt(dk) into Wq

    out = decoder_layer(x, mask_i32, kparams)
    out = jax.block_until_ready(out)

    ref = reference_decoder_layer(x, mask_bool, params)
    # approx softmax reciprocal on real TPU EUP -> mildly relaxed tolerance.
    np.testing.assert_allclose(np.asarray(out), np.asarray(ref), rtol=2e-2, atol=2e-2)

    print("KERNEL_OK")
</pallas_src>

<mosaic_0001>
module attributes {stable_mosaic.version = 11 : i64} {
  func.func @decoder_layer_kernel(%arg0: i32, %arg1: memref<16x32xf32, #tpu.memory_space<vmem>>, %arg2: memref<2x8x8xi32, #tpu.memory_space<vmem>>, %arg3: memref<1x32xf32, #tpu.memory_space<vmem>>, %arg4: memref<1x32xf32, #tpu.memory_space<vmem>>, %arg5: memref<32x32xf32, #tpu.memory_space<vmem>>, %arg6: memref<32x32xf32, #tpu.memory_space<vmem>>, %arg7: memref<32x32xf32, #tpu.memory_space<vmem>>, %arg8: memref<32x32xf32, #tpu.memory_space<vmem>>, %arg9: memref<1x32xf32, #tpu.memory_space<vmem>>, %arg10: memref<1x32xf32, #tpu.memory_space<vmem>>, %arg11: memref<32x64xf32, #tpu.memory_space<vmem>>, %arg12: memref<1x64xf32, #tpu.memory_space<vmem>>, %arg13: memref<64x32xf32, #tpu.memory_space<vmem>>, %arg14: memref<1x32xf32, #tpu.memory_space<vmem>>, %arg15: memref<16x32xf32, #tpu.memory_space<vmem>>) attributes {dimension_semantics = [#tpu.dimension_semantics<arbitrary>], iteration_bounds = array<i64: 1>, scalar_prefetch = 0 : i64, scratch_operands = 0 : i64, tpu.core_type = #tpu.core_type<tc>, window_params = [{pipeline_mode = #tpu.pipeline_mode<synchronous>, transform_indices = @transform_0, window_bounds = array<i64: 16, 32>}, {pipeline_mode = #tpu.pipeline_mode<synchronous>, transform_indices = @transform_1, window_bounds = array<i64: 2, 8, 8>}, {pipeline_mode = #tpu.pipeline_mode<synchronous>, transform_indices = @transform_2, window_bounds = array<i64: 1, 32>}, {pipeline_mode = #tpu.pipeline_mode<synchronous>, transform_indices = @transform_3, window_bounds = array<i64: 1, 32>}, {pipeline_mode = #tpu.pipeline_mode<synchronous>, transform_indices = @transform_4, window_bounds = array<i64: 32, 32>}, {pipeline_mode = #tpu.pipeline_mode<synchronous>, transform_indices = @transform_5, window_bounds = array<i64: 32, 32>}, {pipeline_mode = #tpu.pipeline_mode<synchronous>, transform_indices = @transform_6, window_bounds = array<i64: 32, 32>}, {pipeline_mode = #tpu.pipeline_mode<synchronous>, transform_indices = @transform_7, window_bounds = array<i64: 32, 32>}, {pipeline_mode = #tpu.pipeline_mode<synchronous>, transform_indices = @transform_8, window_bounds = array<i64: 1, 32>}, {pipeline_mode = #tpu.pipeline_mode<synchronous>, transform_indices = @transform_9, window_bounds = array<i64: 1, 32>}, {pipeline_mode = #tpu.pipeline_mode<synchronous>, transform_indices = @transform_10, window_bounds = array<i64: 32, 64>}, {pipeline_mode = #tpu.pipeline_mode<synchronous>, transform_indices = @transform_11, window_bounds = array<i64: 1, 64>}, {pipeline_mode = #tpu.pipeline_mode<synchronous>, transform_indices = @transform_12, window_bounds = array<i64: 64, 32>}, {pipeline_mode = #tpu.pipeline_mode<synchronous>, transform_indices = @transform_13, window_bounds = array<i64: 1, 32>}, {pipeline_mode = #tpu.pipeline_mode<synchronous>, transform_indices = @transform_14, window_bounds = array<i64: 16, 32>}]} {
    %c0 = arith.constant 0 : index
    %c0_0 = arith.constant 0 : index
    %0 = vector.load %arg1[%c0, %c0_0] : memref<16x32xf32, #tpu.memory_space<vmem>>, vector<16x32xf32>
    %c0_1 = arith.constant 0 : index
    %c0_2 = arith.constant 0 : index
    %c0_3 = arith.constant 0 : index
    %1 = vector.load %arg2[%c0_1, %c0_2, %c0_3] : memref<2x8x8xi32, #tpu.memory_space<vmem>>, vector<2x8x8xi32>
    %2 = vector.shape_cast %1 : vector<2x8x8xi32> to vector<2x1x8x8xi32>
    %3 = vector.shape_cast %2 : vector<2x1x8x8xi32> to vector<2x1x8x8xi32>
    %4 = vector.broadcast %3 : vector<2x1x8x8xi32> to vector<2x8x8x8xi32>
    %5 = vector.shape_cast %4 : vector<2x8x8x8xi32> to vector<16x8x8xi32>
    %c0_4 = arith.constant 0 : index
    %c0_5 = arith.constant 0 : index
    %6 = vector.load %arg3[%c0_4, %c0_5] : memref<1x32xf32, #tpu.memory_space<vmem>>, vector<1x32xf32>
    %c0_6 = arith.constant 0 : index
    %c0_7 = arith.constant 0 : index
    %7 = vector.load %arg4[%c0_6, %c0_7] : memref<1x32xf32, #tpu.memory_space<vmem>>, vector<1x32xf32>
    %cst = arith.constant dense<0.000000e+00> : vector<16xf32>
    %8 = vector.multi_reduction <add>, %0, %cst [1] : vector<16x32xf32> to vector<16xf32>
    %9 = vector.shape_cast %8 : vector<16xf32> to vector<16x1xf32>
    %cst_8 = arith.constant 3.200000e+01 : f32
    %10 = vector.broadcast %cst_8 : f32 to vector<16x1xf32>
    %11 = arith.divf %9, %10 : vector<16x1xf32>
    %12 = vector.broadcast %11 : vector<16x1xf32> to vector<16x32xf32>
    %13 = arith.subf %0, %12 : vector<16x32xf32>
    %14 = arith.mulf %13, %13 : vector<16x32xf32>
    %cst_9 = arith.constant dense<0.000000e+00> : vector<16xf32>
    %15 = vector.multi_reduction <add>, %14, %cst_9 [1] : vector<16x32xf32> to vector<16xf32>
    %16 = vector.shape_cast %15 : vector<16xf32> to vector<16x1xf32>
    %cst_10 = arith.constant 3.200000e+01 : f32
    %17 = vector.broadcast %cst_10 : f32 to vector<16x1xf32>
    %18 = arith.divf %16, %17 : vector<16x1xf32>
    %19 = vector.broadcast %11 : vector<16x1xf32> to vector<16x32xf32>
    %20 = arith.subf %0, %19 : vector<16x32xf32>
    %cst_11 = arith.constant 9.99999997E-7 : f32
    %21 = vector.broadcast %cst_11 : f32 to vector<16x1xf32>
    %22 = arith.addf %18, %21 : vector<16x1xf32>
    %23 = math.rsqrt %22 : vector<16x1xf32>
    %24 = vector.broadcast %23 : vector<16x1xf32> to vector<16x32xf32>
    %25 = arith.mulf %20, %24 : vector<16x32xf32>
    %26 = vector.broadcast %6 : vector<1x32xf32> to vector<16x32xf32>
    %27 = arith.mulf %25, %26 : vector<16x32xf32>
    %28 = vector.broadcast %7 : vector<1x32xf32> to vector<16x32xf32>
    %29 = arith.addf %27, %28 : vector<16x32xf32>
    %c0_12 = arith.constant 0 : index
    %c0_13 = arith.constant 0 : index
    %30 = vector.load %arg5[%c0_12, %c0_13] : memref<32x32xf32, #tpu.memory_space<vmem>>, vector<32x32xf32>
    %cst_14 = arith.constant dense<0.000000e+00> : vector<16x32xf32>
    %31 = tpu.matmul %29, %30, %cst_14 {dimension_numbers = #tpu.dot_dimension_numbers<[1], [0], [0], [1], [0, 0, 1, 1], [], []>} : vector<16x32xf32>, vector<32x32xf32>, vector<16x32xf32> -> vector<16x32xf32>
    %c0_15 = arith.constant 0 : index
    %c0_16 = arith.constant 0 : index
    %32 = vector.load %arg6[%c0_15, %c0_16] : memref<32x32xf32, #tpu.memory_space<vmem>>, vector<32x32xf32>
    %cst_17 = arith.constant dense<0.000000e+00> : vector<16x32xf32>
    %33 = tpu.matmul %29, %32, %cst_17 {dimension_numbers = #tpu.dot_dimension_numbers<[1], [0], [0], [1], [0, 0, 1, 1], [], []>} : vector<16x32xf32>, vector<32x32xf32>, vector<16x32xf32> -> vector<16x32xf32>
    %c0_18 = arith.constant 0 : index
    %c0_19 = arith.constant 0 : index
    %34 = vector.load %arg7[%c0_18, %c0_19] : memref<32x32xf32, #tpu.memory_space<vmem>>, vector<32x32xf32>
    %cst_20 = arith.constant dense<0.000000e+00> : vector<16x32xf32>
    %35 = tpu.matmul %29, %34, %cst_20 {dimension_numbers = #tpu.dot_dimension_numbers<[1], [0], [0], [1], [0, 0, 1, 1], [], []>} : vector<16x32xf32>, vector<32x32xf32>, vector<16x32xf32> -> vector<16x32xf32>
    %36 = vector.shape_cast %31 : vector<16x32xf32> to vector<2x8x8x4xf32>
    %37 = tpu.transpose %36, [0, 2, 1, 3] : vector<2x8x8x4xf32> -> vector<2x8x8x4xf32>
    %38 = vector.shape_cast %37 : vector<2x8x8x4xf32> to vector<16x8x4xf32>
    %39 = vector.shape_cast %33 : vector<16x32xf32> to vector<2x8x8x4xf32>
    %40 = tpu.transpose %39, [0, 2, 1, 3] : vector<2x8x8x4xf32> -> vector<2x8x8x4xf32>
    %41 = vector.shape_cast %40 : vector<2x8x8x4xf32> to vector<16x8x4xf32>
    %42 = vector.shape_cast %35 : vector<16x32xf32> to vector<2x8x8x4xf32>
    %43 = tpu.transpose %42, [0, 2, 1, 3] : vector<2x8x8x4xf32> -> vector<2x8x8x4xf32>
    %44 = vector.shape_cast %43 : vector<2x8x8x4xf32> to vector<16x8x4xf32>
    "tpu.trace_start"() <{level = 10 : i32, message = "nqd,nkd->nqk"}> : () -> ()
    %cst_21 = arith.constant dense<0.000000e+00> : vector<16x8x8xf32>
    %45 = tpu.matmul %38, %41, %cst_21 {dimension_numbers = #tpu.dot_dimension_numbers<[2], [2], [1], [1], [0, 0, 0, 1, 1, 1], [0], [0]>} : vector<16x8x4xf32>, vector<16x8x4xf32>, vector<16x8x8xf32> -> vector<16x8x8xf32>
    %c0_i32 = arith.constant 0 : i32
    "tpu.trace_stop"() : () -> ()
    %46 = vector.broadcast %c0_i32 : i32 to vector<16x8x8xi32>
    %47 = arith.cmpi ne, %5, %46 : vector<16x8x8xi32>
    %cst_22 = arith.constant -1.000000e+09 : f32
    %48 = vector.broadcast %cst_22 : f32 to vector<16x8x8xf32>
    %49 = arith.select %47, %48, %45 : vector<16x8x8xi1>, vector<16x8x8xf32>
    %cst_23 = arith.constant dense<0xFF800000> : vector<16x8xf32>
    %50 = vector.multi_reduction <maximumf>, %49, %cst_23 [2] : vector<16x8x8xf32> to vector<16x8xf32>
    %51 = vector.shape_cast %50 : vector<16x8xf32> to vector<16x8x1xf32>
    %52 = vector.broadcast %51 : vector<16x8x1xf32> to vector<16x8x8xf32>
    %53 = arith.subf %49, %52 : vector<16x8x8xf32>
    %54 = math.exp %53 : vector<16x8x8xf32>
    %cst_24 = arith.constant dense<0.000000e+00> : vector<16x8xf32>
    %55 = vector.multi_reduction <add>, %54, %cst_24 [2] : vector<16x8x8xf32> to vector<16x8xf32>
    %56 = vector.shape_cast %55 : vector<16x8xf32> to vector<16x8x1xf32>
    %57 = tpu.reciprocal %56 {approx = true} : vector<16x8x1xf32> -> vector<16x8x1xf32>
    %58 = vector.broadcast %57 : vector<16x8x1xf32> to vector<16x8x8xf32>
    %59 = arith.mulf %54, %58 : vector<16x8x8xf32>
    "tpu.trace_start"() <{level = 10 : i32, message = "nqk,nkd->nqd"}> : () -> ()
    %cst_25 = arith.constant dense<0.000000e+00> : vector<16x8x4xf32>
    %60 = tpu.matmul %59, %44, %cst_25 {dimension_numbers = #tpu.dot_dimension_numbers<[2], [1], [1], [2], [0, 0, 0, 1, 1, 2], [0], [0]>} : vector<16x8x8xf32>, vector<16x8x4xf32>, vector<16x8x4xf32> -> vector<16x8x4xf32>
    "tpu.trace_stop"() : () -> ()
    %61 = vector.shape_cast %60 : vector<16x8x4xf32> to vector<2x8x8x4xf32>
    %62 = tpu.transpose %61, [0, 2, 1, 3] : vector<2x8x8x4xf32> -> vector<2x8x8x4xf32>
    %63 = vector.shape_cast %62 : vector<2x8x8x4xf32> to vector<16x32xf32>
    %c0_26 = arith.constant 0 : index
    %c0_27 = arith.constant 0 : index
    %64 = vector.load %arg8[%c0_26, %c0_27] : memref<32x32xf32, #tpu.memory_space<vmem>>, vector<32x32xf32>
    %cst_28 = arith.constant dense<0.000000e+00> : vector<16x32xf32>
    %65 = tpu.matmul %63, %64, %cst_28 {dimension_numbers = #tpu.dot_dimension_numbers<[1], [0], [0], [1], [0, 0, 1, 1], [], []>} : vector<16x32xf32>, vector<32x32xf32>, vector<16x32xf32> -> vector<16x32xf32>
    %66 = arith.addf %0, %65 : vector<16x32xf32>
    %c0_29 = arith.constant 0 : index
    %c0_30 = arith.constant 0 : index
    %67 = vector.load %arg9[%c0_29, %c0_30] : memref<1x32xf32, #tpu.memory_space<vmem>>, vector<1x32xf32>
    %c0_31 = arith.constant 0 : index
    %c0_32 = arith.constant 0 : index
    %68 = vector.load %arg10[%c0_31, %c0_32] : memref<1x32xf32, #tpu.memory_space<vmem>>, vector<1x32xf32>
    %cst_33 = arith.constant dense<0.000000e+00> : vector<16xf32>
    %69 = vector.multi_reduction <add>, %66, %cst_33 [1] : vector<16x32xf32> to vector<16xf32>
    %70 = vector.shape_cast %69 : vector<16xf32> to vector<16x1xf32>
    %cst_34 = arith.constant 3.200000e+01 : f32
    %71 = vector.broadcast %cst_34 : f32 to vector<16x1xf32>
    %72 = arith.divf %70, %71 : vector<16x1xf32>
    %73 = vector.broadcast %72 : vector<16x1xf32> to vector<16x32xf32>
    %74 = arith.subf %66, %73 : vector<16x32xf32>
    %75 = arith.mulf %74, %74 : vector<16x32xf32>
    %cst_35 = arith.constant dense<0.000000e+00> : vector<16xf32>
    %76 = vector.multi_reduction <add>, %75, %cst_35 [1] : vector<16x32xf32> to vector<16xf32>
    %77 = vector.shape_cast %76 : vector<16xf32> to vector<16x1xf32>
    %cst_36 = arith.constant 3.200000e+01 : f32
    %78 = vector.broadcast %cst_36 : f32 to vector<16x1xf32>
    %79 = arith.divf %77, %78 : vector<16x1xf32>
    %80 = vector.broadcast %72 : vector<16x1xf32> to vector<16x32xf32>
    %81 = arith.subf %66, %80 : vector<16x32xf32>
    %cst_37 = arith.constant 9.99999997E-7 : f32
    %82 = vector.broadcast %cst_37 : f32 to vector<16x1xf32>
    %83 = arith.addf %79, %82 : vector<16x1xf32>
    %84 = math.rsqrt %83 : vector<16x1xf32>
    %85 = vector.broadcast %84 : vector<16x1xf32> to vector<16x32xf32>
    %86 = arith.mulf %81, %85 : vector<16x32xf32>
    %87 = vector.broadcast %67 : vector<1x32xf32> to vector<16x32xf32>
    %88 = arith.mulf %86, %87 : vector<16x32xf32>
    %89 = vector.broadcast %68 : vector<1x32xf32> to vector<16x32xf32>
    %90 = arith.addf %88, %89 : vector<16x32xf32>
    %c0_38 = arith.constant 0 : index
    %c0_39 = arith.constant 0 : index
    %91 = vector.load %arg11[%c0_38, %c0_39] : memref<32x64xf32, #tpu.memory_space<vmem>>, vector<32x64xf32>
    %cst_40 = arith.constant dense<0.000000e+00> : vector<16x64xf32>
    %92 = tpu.matmul %90, %91, %cst_40 {dimension_numbers = #tpu.dot_dimension_numbers<[1], [0], [0], [1], [0, 0, 1, 1], [], []>} : vector<16x32xf32>, vector<32x64xf32>, vector<16x64xf32> -> vector<16x64xf32>
    %c0_41 = arith.constant 0 : index
    %c0_42 = arith.constant 0 : index
    %93 = vector.load %arg12[%c0_41, %c0_42] : memref<1x64xf32, #tpu.memory_space<vmem>>, vector<1x64xf32>
    %94 = vector.broadcast %93 : vector<1x64xf32> to vector<16x64xf32>
    %95 = arith.addf %92, %94 : vector<16x64xf32>
    %cst_43 = arith.constant 0.000000e+00 : f32
    %96 = vector.broadcast %cst_43 : f32 to vector<16x64xf32>
    %97 = arith.maximumf %95, %96 : vector<16x64xf32>
    %c0_44 = arith.constant 0 : index
    %c0_45 = arith.constant 0 : index
    %98 = vector.load %arg13[%c0_44, %c0_45] : memref<64x32xf32, #tpu.memory_space<vmem>>, vector<64x32xf32>
    %cst_46 = arith.constant dense<0.000000e+00> : vector<16x32xf32>
    %99 = tpu.matmul %97, %98, %cst_46 {dimension_numbers = #tpu.dot_dimension_numbers<[1], [0], [0], [1], [0, 0, 1, 1], [], []>} : vector<16x64xf32>, vector<64x32xf32>, vector<16x32xf32> -> vector<16x32xf32>
    %c0_47 = arith.constant 0 : index
    %c0_48 = arith.constant 0 : index
    %100 = vector.load %arg14[%c0_47, %c0_48] : memref<1x32xf32, #tpu.memory_space<vmem>>, vector<1x32xf32>
    %101 = vector.broadcast %100 : vector<1x32xf32> to vector<16x32xf32>
    %102 = arith.addf %99, %101 : vector<16x32xf32>
    %103 = arith.addf %66, %102 : vector<16x32xf32>
    %c0_49 = arith.constant 0 : index
    %c0_50 = arith.constant 0 : index
    %104 = vector.load %arg15[%c0_49, %c0_50] : memref<16x32xf32, #tpu.memory_space<vmem>>, vector<16x32xf32>
    tpu.vector_store %arg15[%c0_49, %c0_50], %103 {strides = array<i32>} : memref<16x32xf32, #tpu.memory_space<vmem>>, vector<16x32xf32>,
    return
  }
  func.func @transform_0(%arg0: i32) -> (i32, i32) {
    %c0_i32 = arith.constant 0 : i32
    %c0_i32_0 = arith.constant 0 : i32
    %c0_i32_1 = arith.constant 0 : i32
    return %c0_i32, %c0_i32_0 : i32, i32
  }
  func.func @transform_1(%arg0: i32) -> (i32, i32, i32) {
    %c0_i32 = arith.constant 0 : i32
    %c0_i32_0 = arith.constant 0 : i32
    %c0_i32_1 = arith.constant 0 : i32
    %c0_i32_2 = arith.constant 0 : i32
    return %c0_i32, %c0_i32_0, %c0_i32_1 : i32, i32, i32
  }
  func.func @transform_2(%arg0: i32) -> (i32, i32) {
    %c0_i32 = arith.constant 0 : i32
    %c0_i32_0 = arith.constant 0 : i32
    %c0_i32_1 = arith.constant 0 : i32
    return %c0_i32, %c0_i32_0 : i32, i32
  }
  func.func @transform_3(%arg0: i32) -> (i32, i32) {
    %c0_i32 = arith.constant 0 : i32
    %c0_i32_0 = arith.constant 0 : i32
    %c0_i32_1 = arith.constant 0 : i32
    return %c0_i32, %c0_i32_0 : i32, i32
  }
  func.func @transform_4(%arg0: i32) -> (i32, i32) {
    %c0_i32 = arith.constant 0 : i32
    %c0_i32_0 = arith.constant 0 : i32
    %c0_i32_1 = arith.constant 0 : i32
    return %c0_i32, %c0_i32_0 : i32, i32
  }
  func.func @transform_5(%arg0: i32) -> (i32, i32) {
    %c0_i32 = arith.constant 0 : i32
    %c0_i32_0 = arith.constant 0 : i32
    %c0_i32_1 = arith.constant 0 : i32
    return %c0_i32, %c0_i32_0 : i32, i32
  }
  func.func @transform_6(%arg0: i32) -> (i32, i32) {
    %c0_i32 = arith.constant 0 : i32
    %c0_i32_0 = arith.constant 0 : i32
    %c0_i32_1 = arith.constant 0 : i32
    return %c0_i32, %c0_i32_0 : i32, i32
  }
  func.func @transform_7(%arg0: i32) -> (i32, i32) {
    %c0_i32 = arith.constant 0 : i32
    %c0_i32_0 = arith.constant 0 : i32
    %c0_i32_1 = arith.constant 0 : i32
    return %c0_i32, %c0_i32_0 : i32, i32
  }
  func.func @transform_8(%arg0: i32) -> (i32, i32) {
    %c0_i32 = arith.constant 0 : i32
    %c0_i32_0 = arith.constant 0 : i32
    %c0_i32_1 = arith.constant 0 : i32
    return %c0_i32, %c0_i32_0 : i32, i32
  }
  func.func @transform_9(%arg0: i32) -> (i32, i32) {
    %c0_i32 = arith.constant 0 : i32
    %c0_i32_0 = arith.constant 0 : i32
    %c0_i32_1 = arith.constant 0 : i32
    return %c0_i32, %c0_i32_0 : i32, i32
  }
  func.func @transform_10(%arg0: i32) -> (i32, i32) {
    %c0_i32 = arith.constant 0 : i32
    %c0_i32_0 = arith.constant 0 : i32
    %c0_i32_1 = arith.constant 0 : i32
    return %c0_i32, %c0_i32_0 : i32, i32
  }
  func.func @transform_11(%arg0: i32) -> (i32, i32) {
    %c0_i32 = arith.constant 0 : i32
    %c0_i32_0 = arith.constant 0 : i32
    %c0_i32_1 = arith.constant 0 : i32
    return %c0_i32, %c0_i32_0 : i32, i32
  }
  func.func @transform_12(%arg0: i32) -> (i32, i32) {
    %c0_i32 = arith.constant 0 : i32
    %c0_i32_0 = arith.constant 0 : i32
    %c0_i32_1 = arith.constant 0 : i32
    return %c0_i32, %c0_i32_0 : i32, i32
  }
  func.func @transform_13(%arg0: i32) -> (i32, i32) {
    %c0_i32 = arith.constant 0 : i32
    %c0_i32_0 = arith.constant 0 : i32
    %c0_i32_1 = arith.constant 0 : i32
    return %c0_i32, %c0_i32_0 : i32, i32
  }
  func.func @transform_14(%arg0: i32) -> (i32, i32) {
    %c0_i32 = arith.constant 0 : i32
    %c0_i32_0 = arith.constant 0 : i32
    %c0_i32_1 = arith.constant 0 : i32
    return %c0_i32, %c0_i32_0 : i32, i32
  }
}

</mosaic_0001>

<bundles_post_ra>
// kernel: tpu_custom_call.1
= control target key start
LH: loop header
LB: loop body
LE: loop exit
PB: predicated region body
PF: predicated region fallthrough
CT: control target
= control target key end

     0   :  { %19 = vsyncpa [#allocation3], 0  ;;  %s7811_s0 = inlined_call_operand.hbm [shape: f32[16,32], index: 0, kind: input, shape index: {}]   ;;  %s7812_s1 = inlined_call_operand.hbm [shape: s32[2,8,8], index: 1, kind: input, shape index: {}]   ;;  %s7813_s2 = inlined_call_operand.vmem [shape: f32[1,32], index: 2, kind: input, shape index: {}]   ;;  %s7814_s3 = inlined_call_operand.vmem [shape: f32[1,32], index: 3, kind: input, shape index: {}]   ;;  %s7815_s4 = inlined_call_operand.vmem [shape: f32[32,32], index: 4, kind: input, shape index: {}]   ;;  %s7816_s5 = inlined_call_operand.vmem [shape: f32[32,32], index: 5, kind: input, shape index: {}]   ;;  %s7817_s6 = inlined_call_operand.vmem [shape: f32[32,32], index: 6, kind: input, shape index: {}]   ;;  %s7818_s7 = inlined_call_operand.hbm [shape: f32[32,32], index: 7, kind: input, shape index: {}]   ;;  %s7819_s8 = inlined_call_operand.vmem [shape: f32[1,32], index: 8, kind: input, shape index: {}]   ;;  %s7820_s9 = inlined_call_operand.vmem [shape: f32[1,32], index: 9, kind: input, shape index: {}]   ;;  %s7821_s10 = inlined_call_operand.hbm [shape: f32[32,64], index: 10, kind: input, shape index: {}]   ;;  %s7822_s11 = inlined_call_operand.vmem [shape: f32[1,64], index: 11, kind: input, shape index: {}]   ;;  %s7823_s12 = inlined_call_operand.vmem [shape: f32[64,32], index: 12, kind: input, shape index: {}]   ;;  %s7824_s13 = inlined_call_operand.vmem [shape: f32[1,32], index: 13, kind: input, shape index: {}]   ;;  %s7825_s14 = inlined_call_operand.hbm [shape: f32[16,32], index: 14, kind: output, shape index: {}]  }
   0x1   :  { %20 = vsyncpa [#allocation6], 0 }
   0x2   :  { %21 = vsyncpa [#allocation9], 0 }
   0x3   :  { %22 = vsyncpa [#allocation4], 0  ;;  %s6444_s29 = smov [#allocation5]   ;;  %s6445_s15 = smov [#allocation2]  }
   0x4   :  { %s40_s30 = sshll.u32 %s6444_s29, 4  ;;  %s28_s16 = sshll.u32 %s6445_s15, 4  ;;  %s41_s30 = int_to_ptr.vmem [resolvable:$true] %s40_s30  ;;  %s6543_s16 = int_to_ptr.vmem [resolvable:$true] %s28_s16 }
   0x5   :  { %s6326_s19 = scalar_lea.hbm %s7812_s1, 256 }
   0x6   :  { %p6327_p0 = scmp.ne.s32.totalorder %s7812_s1, %s6326_s19  ;;  %p6330_p1 = scmp.lt.u32.totalorder %s6326_s19, %s7812_s1 }
   0x8   :  { %p6332_p2 = pnand %p6330_p1, %p6327_p0 }
   0xa   :  { %6335 = shalt.err (!%p6332_p2)
}
   0xb   :  { %s6336_s24 = scalar_lea.vmem %s41_s30, 256  ;;  %p6341_p4 = scmp.lt.s32.totalorder %s41_s30, %s41_s30 }
   0xc   :  { %p6337_p3 = scmp.ne.s32.totalorder %s41_s30, %s6336_s24  ;;  %p6342_p5 = scmp.lt.s32.totalorder %s6336_s24, %s6336_s24 }
   0xe   :  { %p6343_p6 = por %p6342_p5, %p6341_p4 }
  0x10   :  { %p6344_p7 = pnand %p6343_p6, %p6337_p3 }
  0x12   :  { %6347 = shalt.err (!%p6344_p7)
}
  0x13   :  { %s6446_s25 = smov 128   ;;  %s6447_s26 = smov 8  }
  0x14   :  { %46 = dma.hbm_to_vmem [thread:$0]  %s7812_s1, 256, %s41_s30, [#allocation6], %s6446_s25, %s6446_s25, %s6447_s26  }
  0x15   :  { %s6348_s17 = scalar_lea.hbm %s7811_s0, 256 }
  0x16   :  { %p6349_p8 = scmp.ne.s32.totalorder %s7811_s0, %s6348_s17  ;;  %p6352_p9 = scmp.lt.u32.totalorder %s6348_s17, %s7811_s0 }
  0x18   :  { %p6354_p10 = pnand %p6352_p9, %p6349_p8 }
  0x1a   :  { %6357 = shalt.err (!%p6354_p10)
}
  0x1b   :  { %s6358_s22 = scalar_lea.vmem %s6543_s16, 256  ;;  %p6363_p12 = scmp.lt.s32.totalorder %s6543_s16, %s6543_s16 }
  0x1c   :  { %p6359_p11 = scmp.ne.s32.totalorder %s6543_s16, %s6358_s22  ;;  %p6364_p13 = scmp.lt.s32.totalorder %s6358_s22, %s6358_s22 }
  0x1e   :  { %p6365_p0 = por %p6364_p13, %p6363_p12 }
  0x20   :  { %p6366_p1 = pnand %p6365_p0, %p6359_p11 }
  0x22   :  { %6369 = shalt.err (!%p6366_p1)
}
  0x23   :  { %34 = dma.hbm_to_vmem [thread:$0]  %s7811_s0, 256, %s6543_s16, [#allocation3], %s6446_s25, %s6446_s25, %s6447_s26  }
  0x24   :  { %s6448_s23 = smov [#allocation7]   ;;  %s6449_s27 = smov [#allocation8]  }
  0x25   :  { %s62_s24 = sshll.u32 %s6448_s23, 4  ;;  %s78_s28 = sshll.u32 %s6449_s27, 4  ;;  %s63_s24 = int_to_ptr.vmem [resolvable:$true] %s62_s24  ;;  %s6580_s28 = int_to_ptr.vmem [resolvable:$true] %s78_s28 }
  0x26   :  { %s6370_s17 = scalar_lea.hbm %s7818_s7, 512 }
  0x27   :  { %p6371_p2 = scmp.ne.s32.totalorder %s7818_s7, %s6370_s17  ;;  %p6374_p3 = scmp.lt.u32.totalorder %s6370_s17, %s7818_s7 }
  0x29   :  { %p6376_p4 = pnand %p6374_p3, %p6371_p2 }
  0x2b   :  { %6379 = shalt.err (!%p6376_p4)
}
  0x2c   :  { %s6380_s0 = scalar_lea.vmem %s63_s24, 512  ;;  %p6385_p6 = scmp.lt.s32.totalorder %s63_s24, %s63_s24 }
  0x2d   :  { %p6381_p5 = scmp.ne.s32.totalorder %s63_s24, %s6380_s0  ;;  %p6386_p7 = scmp.lt.s32.totalorder %s6380_s0, %s6380_s0 }
  0x2f   :  { %p6387_p8 = por %p6386_p7, %p6385_p6 }
  0x31   :  { %p6388_p9 = pnand %p6387_p8, %p6381_p5 }
  0x33   :  { %6391 = shalt.err (!%p6388_p9)
}
  0x34   :  { %68 = dma.hbm_to_vmem [thread:$0]  %s7818_s7, 512, %s63_s24, [#allocation6], %s6446_s25, %s6446_s25, %s6447_s26  }
  0x35   :  { %s6392_s23 = scalar_lea.hbm %s7821_s10, 512 }
  0x36   :  { %p6393_p10 = scmp.ne.s32.totalorder %s7821_s10, %s6392_s23  ;;  %p6396_p11 = scmp.lt.u32.totalorder %s6392_s23, %s7821_s10 }
  0x38   :  { %p6398_p12 = pnand %p6396_p11, %p6393_p10 }
  0x3a   :  { %6401 = shalt.err (!%p6398_p12)
}
  0x3b   :  { %s6402_s18 = scalar_lea.vmem %s6580_s28, 512  ;;  %p6407_p0 = scmp.lt.s32.totalorder %s6580_s28, %s6580_s28 }
  0x3c   :  { %p6403_p13 = scmp.ne.s32.totalorder %s6580_s28, %s6402_s18  ;;  %p6408_p1 = scmp.lt.s32.totalorder %s6402_s18, %s6402_s18 }
  0x3e   :  { %p6409_p2 = por %p6408_p1, %p6407_p0 }
  0x40   :  { %p6410_p3 = pnand %p6409_p2, %p6403_p13 }
  0x42   :  { %6413 = shalt.err (!%p6410_p3)
}
  0x43   :  { %84 = dma.hbm_to_vmem [thread:$0]  %s7821_s10, 512, %s6580_s28, [#allocation9], %s6446_s25, %s6446_s25, %s6447_s26  }
  0x44   :  { %6436 = dma.done.wait [#allocation3], 256  }
  0x45   :  { %6437 = vsyncadd [#allocation3], 4294967040 }
  0x46   :  { %6438 = dma.done.wait [#allocation6], 768  }
  0x47   :  { %6439 = vsyncadd [#allocation6], 4294966528 }
  0x48   :  { %6440 = dma.done.wait [#allocation9], 512  }
  0x49   :  { %6441 = vsyncadd [#allocation9], 4294966784  ;;  %vm109_vm0 = vcmask 261120   ;;  %v103_v0 = vld [vmem:[#allocation2] sm:$0xff]  ;;  %v104_v1 = vld [vmem:[#allocation2 + $0x8] sm:$0xff]  ;;  %s6453_s1 = smov 116   ;;  %v445_v57 = vlaneseq }
  0x4a   :  { %v110_v2 = vsel %vm109_vm0, %v103_v0, 0.0  ;;  %v113_v3 = vsel %vm109_vm0, %v104_v1, 0.0  ;;  %v153_v14 = vld [vmem:[%s7815_s4] sm:$0xff]  ;;  %v154_v15 = vld [vmem:[%s7815_s4 + $0x8] sm:$0xff]  ;;  %v155_v19 = vld [vmem:[%s7815_s4 + $0x10] sm:$0xff]  ;;  %s6454_s30 = smov 104  }
  0x4b   :  { %111 = vadd.xlane.f32.xlu0 %v110_v2  ;;  %v317_v16 = vld [vmem:[%s7817_s6] sm:$0xff]  ;;  %v6172_v17 = vpack.c.bf16 %v154_v15, %v153_v14  ;;  %v318_v18 = vld [vmem:[%s7817_s6 + $0x8] sm:$0xff]  ;;  %v156_v20 = vld [vmem:[%s7815_s4 + $0x18] sm:$0xff]  ;;  %s6455_s23 = smov 108   ;;  %s6456_s27 = smov 100   ;;  %v6457_v54 = vmov 0.0  }
  0x4c   :  { %v6188_v21 = vpack.c.bf16 %v318_v18, %v317_v16  ;;  %v6176_v22 = vpack.c.bf16 %v156_v20, %v155_v19  ;;  %v319_v23 = vld [vmem:[%s7817_s6 + $0x10] sm:$0xff]  ;;  %v320_v24 = vld [vmem:[%s7817_s6 + $0x18] sm:$0xff]  ;;  %v238_v26 = vld [vmem:[%s7816_s5] sm:$0xff]  ;;  %vm6458_vm1 = vmmov 0   ;;  %v6459_v55 = vmov 1983009808  }
  0x4d   :  { %6173 = vmatprep.subr.bf16.mxu1 %v6172_v17  ;;  %v6192_v25 = vpack.c.bf16 %v320_v24, %v319_v23  ;;  %v239_v27 = vld [vmem:[%s7816_s5 + $0x8] sm:$0xff]  ;;  %v5704_v36 = vld [vmem:[%s7813_s2] ss:$0 sm:$0xff]  ;;  %v240_v43 = vld [vmem:[%s7816_s5 + $0x10] sm:$0xff]  ;;  %s6450_s2 = smov 120   ;;  %v443_v56 = vunpack.c.l.s4 %v6459_v55  ;;  %v446_v61 = vshrl.u32 %v445_v57, 7 }
  0x4e   :  { %6175 = vmatpush3.bf16.msra.mxu1 %v6172_v17  ;;  %6189 = vmatprep.subr.bf16.mxu0 %v6188_v21  ;;  %v6180_v28 = vpack.c.bf16 %v239_v27, %v238_v26  ;;  %v5705_v38 = vld [vmem:[%s7814_s3] ss:$0 sm:$0xff]  ;;  %v241_v44 = vld [vmem:[%s7816_s5 + $0x18] sm:$0xff]  ;;  %s6451_s3 = smov 124   ;;  %s6452_s5 = smov 112   ;;  %vm2160_vm2 = vcmask 31744  }
  0x4f   :  { %114 = vadd.xlane.f32.xlu0 %v113_v3  ;;  %6191 = vmatpush3.bf16.msra.mxu0 %v6188_v21  ;;  %v6184_v47 = vpack.c.bf16 %v241_v44, %v240_v43  ;;  %v6460_v58 = vmov 1934713408   ;;  %v444_v60 = vunpack.c.0.s8 %v443_v56  ;;  %vm3395_vm4 = vcmask 64512   ;;  %s6461_s29 = smov 4   ;;  %s6462_s15 = smov 12  }
  0x50   :  { %6177 = vmatprep.subr.bf16.mxu1 %v6176_v22  ;;  %6193 = vmatprep.subr.bf16.mxu0 %v6192_v25  ;;  %v507_v59 = vunpack.c.l.s4 %v6460_v58  ;;  %s6463_s17 = smov 16   ;;  %s6464_s18 = smov 20   ;;  %vm5344_vm6 = vcmask 97280   ;;  %vm5347_vm7 = vcmask 130048   ;;  %vm5350_vm8 = vcmask 162816  }
  0x51   :  { %s6465_s7 = smov 24   ;;  %s6466_s4 = smov 28   ;;  %vm5353_vm9 = vcmask 195584   ;;  %vm5356_vm10 = vcmask 228352   ;;  %vm5599_vm11 = vcmask 523264  }
  0x52   :  { %6179 = vmatpush3.bf16.msra.mxu1 %v6176_v22 }
  0x53   :  { %6195 = vmatpush3.bf16.msra.mxu0 %v6192_v25  ;;  %6181 = vmatprep.subr.bf16.mxu1 %v6180_v28 }
  0x54   :  { %5981 = vmatprep.subr.mxu0 %v6457_v54 }
  0xd8   :  { %v112_v4 = vpop.xlane.xlu0 %111 }
  0xd9   :  { %v117_v5 = vmul.f32 0.03125, %v112_v4 }
  0xdb   :  { %v119_v6 = vsub.f32 %v103_v0, %v117_v5  ;;  %v508_v0 = vunpack.c.0.s8 %v507_v59 }
  0xdc   :  { %v115_v7 = vpop.xlane.xlu0 %114 }
  0xdd   :  { %v118_v8 = vmul.f32 0.03125, %v115_v7  ;;  %v121_v9 = vmul.f32 %v119_v6, %v119_v6 }
  0xdf   :  { %v120_v10 = vsub.f32 %v104_v1, %v118_v8  ;;  %v123_v11 = vsel %vm109_vm0, %v121_v9, 0.0  ;;  %v6759_v1 = vsub.s32 %v444_v60, %v446_v61  ;;  %v6763_v8 = vsub.s32 %v508_v0, %v446_v61 }
  0xe0   :  { %124 = vadd.xlane.f32.xlu1 %v123_v11 }
  0xe1   :  { %v122_v12 = vmul.f32 %v120_v10, %v120_v10 }
  0xe3   :  { %v126_v13 = vsel %vm109_vm0, %v122_v12, 0.0 }
  0xe4   :  { %127 = vadd.xlane.f32.xlu1 %v126_v13 }
 0x16d   :  { %v125_v29 = vpop.xlane.xlu1 %124 }
 0x16e   :  { %v129_v30 = vmul.f32 0.03125, %v125_v29 }
 0x170   :  { %v131_v31 = vadd.f32 1e-06, %v129_v30 }
 0x171   :  { %v128_v32 = vpop.xlane.xlu1 %127 }
 0x172   :  { %6252 = vrsqrt.f32 %v131_v31  ;;  %v130_v33 = vmul.f32 0.03125, %v128_v32 }
 0x174   :  { %v132_v34 = vadd.f32 1e-06, %v130_v33 }
 0x176   :  { %6254 = vrsqrt.f32 %v132_v34 }
 0x17c   :  { %v6253_v35 = vpop.eup %6252 }
 0x17d   :  { %v135_v37 = vmul.f32 %v6253_v35, %v119_v6 }
 0x17f   :  { %v143_v39 = vmul.f32 %v5704_v36, %v135_v37 }
 0x180   :  { %v6255_v40 = vpop.eup %6254 }
 0x181   :  { %v136_v41 = vmul.f32 %v6255_v40, %v120_v10  ;;  %v151_v42 = vadd.f32 %v5705_v38, %v143_v39 }
 0x183   :  { %v144_v45 = vmul.f32 %v5704_v36, %v136_v41  ;;  %5946 = vmatprep.mubr.msk.f32.mxu1 %vm109_vm0, %v151_v42  ;;  %5968 = vmatprep.mubr.msk.f32.mxu0 %vm109_vm0, %v151_v42 }
 0x185   :  { %v152_v46 = vadd.f32 %v5705_v38, %v144_v45 }
 0x187   :  { %5947 = vmatmul.mubr.msk.f32.vlgmr.msra.gmra.mrb[0].mxu1 %vm109_vm0, %v152_v46  ;;  %5969 = vmatmul.mubr.msk.f32.vlgmr.msra.gmra.mrb[0].mxu0 %vm109_vm0, %v152_v46 }
 0x188   :  { %6183 = vmatpush3.bf16.msra.mxu1 %v6180_v28  ;;  %5957 = vmatprep.mubr.msk.f32.mxu1 %vm109_vm0, %v151_v42 }
 0x189   :  { %6185 = vmatprep.subr.bf16.mxu1 %v6184_v47  ;;  %5983 = vmatprep.mubr.msk.f32.mxu0 %vm6458_vm1, %v6457_v54 }
 0x18c   :  { %6187 = vmatpush3.bf16.msra.mxu1 %v6184_v47 }
 0x18d   :  { %5971 = vmatprep.subr.mxu1 %v6457_v54 }
 0x18f   :  { %5958 = vmatmul.mubr.msk.f32.vlgmr.msra.gmra.mrb[2].mxu1 %vm109_vm0, %v152_v46 }
 0x190   :  { %5973 = vmatprep.mubr.msk.f32.mxu1 %vm6458_vm1, %v6457_v54 }
 0x25a   :  { %v6669_v48 = vpop.f32.mrb[0].mxu1  ;;  %v6671_v49 = vpop.f32.mrb[0].mxu0 }
 0x25b   :  { %v6673_v50 = vpop.f32.mrb[1].mxu1  ;;  %v6675_v51 = vpop.f32.mrb[1].mxu0 }
 0x25c   :  { %404 = vrot.lane.b32.xlu0 %v6673_v50, %s6450_s2  ;;  %398 = vrot.lane.b32.xlu1 %v6673_v50, %s6451_s3 }
 0x260   :  { %416 = vrot.lane.b32.xlu0 %v6673_v50, %s6452_s5  ;;  %410 = vrot.lane.b32.xlu1 %v6673_v50, %s6453_s1 }
 0x262   :  { %v6685_v52 = vpop.f32.mrb[2].mxu1 }
 0x263   :  { %v6687_v53 = vpop.f32.mrb[3].mxu1 }
 0x264   :  { %428 = vrot.lane.b32.xlu0 %v6673_v50, %s6454_s30  ;;  %422 = vrot.lane.b32.xlu1 %v6673_v50, %s6455_s23 }
 0x268   :  { %434 = vrot.lane.b32.xlu1 %v6673_v50, %s6456_s27  ;;  %988 = vrot.lane.b32.xlu0 %v6685_v52, %s6451_s3 }
 0x26c   :  { %994 = vrot.lane.b32.xlu1 %v6685_v52, %s6450_s2  ;;  %986 = vrot.lane.b32.xlu0 %v6687_v53, %s6451_s3 }
 0x270   :  { %992 = vrot.lane.b32.xlu1 %v6687_v53, %s6450_s2  ;;  %1000 = vrot.lane.b32.xlu0 %v6685_v52, %s6453_s1 }
 0x274   :  { %998 = vrot.lane.b32.xlu1 %v6687_v53, %s6453_s1  ;;  %1004 = vrot.lane.b32.xlu0 %v6687_v53, %s6452_s5 }
 0x278   :  { %400 = vrot.lane.b32.xlu1 %v6669_v48, %s6451_s3  ;;  %1016 = vrot.lane.b32.xlu0 %v6687_v53, %s6454_s30 }
 0x27c   :  { %1010 = vrot.lane.b32.xlu1 %v6687_v53, %s6455_s23  ;;  %406 = vrot.lane.b32.xlu0 %v6669_v48, %s6450_s2 }
 0x280   :  { %1022 = vrot.lane.b32.xlu1 %v6687_v53, %s6456_s27  ;;  %1006 = vrot.lane.b32.xlu0 %v6685_v52, %s6452_s5 }
 0x284   :  { %412 = vrot.lane.b32.xlu1 %v6669_v48, %s6453_s1  ;;  %1018 = vrot.lane.b32.xlu0 %v6685_v52, %s6454_s30 }
 0x288   :  { %1012 = vrot.lane.b32.xlu1 %v6685_v52, %s6455_s23  ;;  %418 = vrot.lane.b32.xlu0 %v6669_v48, %s6452_s5 }
 0x28c   :  { %1024 = vrot.lane.b32.xlu1 %v6685_v52, %s6456_s27  ;;  %430 = vrot.lane.b32.xlu0 %v6669_v48, %s6454_s30 }
 0x290   :  { %424 = vrot.lane.b32.xlu1 %v6669_v48, %s6455_s23  ;;  %1574 = vrot.lane.b32.xlu0 %v6675_v51, %s6451_s3 }
 0x294   :  { %436 = vrot.lane.b32.xlu1 %v6669_v48, %s6456_s27  ;;  %1598 = vrot.lane.b32.xlu0 %v6675_v51, %s6455_s23 }
 0x298   :  { %1580 = vrot.lane.b32.xlu1 %v6675_v51, %s6450_s2 }
 0x29c   :  { %1586 = vrot.lane.b32.xlu1 %v6675_v51, %s6453_s1 }
 0x2a0   :  { %1592 = vrot.lane.b32.xlu1 %v6675_v51, %s6452_s5 }
 0x2a4   :  { %1604 = vrot.lane.b32.xlu1 %v6675_v51, %s6454_s30 }
 0x2a8   :  { %1610 = vrot.lane.b32.xlu1 %v6675_v51, %s6456_s27 }
 0x2ac   :  { %1576 = vrot.lane.b32.xlu1 %v6671_v49, %s6451_s3 }
 0x2ce   :  { %v405_v62 = vpop.permute.xlu0 %404  ;;  %v399_v63 = vpop.permute.xlu1 %398 }
 0x2cf   :  { %v440_v2 = vcombine.low %v6673_v50, %v405_v62  ;;  %v441_v3 = vcombine.high %v6673_v50, %v405_v62 }
 0x2d1   :  { %v448_v9 = vrot.slane %v440_v2, %v6759_v1  ;;  %v455_v10 = vrot.slane %v441_v3, %v6759_v1 }
 0x2d2   :  { %v417_v4 = vpop.permute.xlu0 %416  ;;  %v411_v5 = vpop.permute.xlu1 %410 }
 0x2d3   :  { %v456_v6 = vcombine.low %v399_v63, %v411_v5  ;;  %v457_v7 = vcombine.high %v399_v63, %v411_v5 }
 0x2d5   :  { %v464_v11 = vrot.slane %v456_v6, %v6759_v1  ;;  %v471_v12 = vrot.slane %v457_v7, %v6759_v1 }
 0x2d6   :  { %v429_v13 = vpop.permute.xlu0 %428  ;;  %v423_v14 = vpop.permute.xlu1 %422 }
 0x2d7   :  { %v504_v15 = vcombine.low %v448_v9, %v464_v11  ;;  %v505_v16 = vcombine.high %v448_v9, %v464_v11  ;;  %v520_v17 = vcombine.low %v455_v10, %v471_v12  ;;  %v521_v18 = vcombine.high %v455_v10, %v471_v12 }
 0x2d8   :  { %v472_v23 = vcombine.low %v417_v4, %v429_v13  ;;  %v473_v24 = vcombine.high %v417_v4, %v429_v13 }
 0x2d9   :  { %v512_v19 = vrot.slane %v504_v15, %v6763_v8  ;;  %v519_v20 = vrot.slane %v505_v16, %v6763_v8  ;;  %v528_v21 = vrot.slane %v520_v17, %v6763_v8  ;;  %v535_v22 = vrot.slane %v521_v18, %v6763_v8 }
 0x2da   :  { %v435_v25 = vpop.permute.xlu1 %434  ;;  %v989_v26 = vpop.permute.xlu0 %988  ;;  %v480_v37 = vrot.slane %v472_v23, %v6759_v1  ;;  %v487_v38 = vrot.slane %v473_v24, %v6759_v1 }
 0x2db   :  { %v5712_v27 = vcombine.low %v512_v19, %v519_v20  ;;  %v5714_v28 = vcombine.high %v512_v19, %v519_v20  ;;  %v5716_v29 = vcombine.low %v528_v21, %v535_v22  ;;  %v5718_v30 = vcombine.high %v528_v21, %v535_v22 }
 0x2dc   :  { %v488_v31 = vcombine.low %v423_v14, %v435_v25  ;;  %v489_v32 = vcombine.high %v423_v14, %v435_v25 }
 0x2dd   :  { %v6774_v33 = vrot.slane %v5712_v27, %v6759_v1  ;;  %v6777_v34 = vrot.slane %v5714_v28, %v6759_v1  ;;  %v6780_v35 = vrot.slane %v5716_v29, %v6759_v1  ;;  %v6783_v36 = vrot.slane %v5718_v30, %v6759_v1 }
 0x2de   :  { %v496_v39 = vrot.slane %v488_v31, %v6759_v1  ;;  %v503_v40 = vrot.slane %v489_v32, %v6759_v1  ;;  %v995_v41 = vpop.permute.xlu1 %994  ;;  %v987_v42 = vpop.permute.xlu0 %986 }
 0x2df   :  { %v776_v43 = vcombine.low %v6774_v33, %v6777_v34  ;;  %v777_v44 = vcombine.high %v6774_v33, %v6777_v34  ;;  %v808_v45 = vcombine.low %v6780_v35, %v6783_v36  ;;  %v809_v46 = vcombine.high %v6780_v35, %v6783_v36 }
 0x2e0   :  { %v536_v47 = vcombine.low %v480_v37, %v496_v39  ;;  %v537_v50 = vcombine.high %v480_v37, %v496_v39  ;;  %v552_v55 = vcombine.low %v487_v38, %v503_v40  ;;  %v553_v56 = vcombine.high %v487_v38, %v503_v40 }
 0x2e1   :  { %v1164_v57 = vcombine.low %v6685_v52, %v995_v41  ;;  %v1165_v58 = vcombine.high %v6685_v52, %v995_v41  ;;  %v6800_v59 = vrot.slane %v776_v43, %v6763_v8  ;;  %v6803_v60 = vrot.slane %v808_v45, %v6763_v8 }
 0x2e2   :  { %v544_v61 = vrot.slane %v536_v47, %v6763_v8  ;;  %v551_v62 = vrot.slane %v537_v50, %v6763_v8  ;;  %v560_v63 = vrot.slane %v552_v55, %v6763_v8  ;;  %v567_v0 = vrot.slane %v553_v56, %v6763_v8  ;;  %v993_v2 = vpop.permute.xlu1 %992  ;;  %v1001_v3 = vpop.permute.xlu0 %1000 }
 0x2e3   :  { %v1172_v4 = vrot.slane %v1164_v57, %v6759_v1  ;;  %v1179_v52 = vrot.slane %v1165_v58, %v6759_v1  ;;  %v1028_v5 = vcombine.low %v6687_v53, %v993_v2  ;;  %v1029_v6 = vcombine.high %v6687_v53, %v993_v2 }
 0x2e4   :  { %v5713_v7 = vcombine.low %v544_v61, %v551_v62  ;;  %v5715_v9 = vcombine.high %v544_v61, %v551_v62  ;;  %v5717_v10 = vcombine.low %v560_v63, %v567_v0  ;;  %v5719_v11 = vcombine.high %v560_v63, %v567_v0 }
 0x2e5   :  { %v1036_v12 = vrot.slane %v1028_v5, %v6759_v1  ;;  %v1043_v13 = vrot.slane %v1029_v6, %v6759_v1  ;;  %v1180_v14 = vcombine.low %v989_v26, %v1001_v3  ;;  %v1181_v15 = vcombine.high %v989_v26, %v1001_v3 }
 0x2e6   :  { %v6816_v16 = vrot.slane %v5713_v7, %v6759_v1  ;;  %v6819_v17 = vrot.slane %v5715_v9, %v6759_v1  ;;  %v6822_v18 = vrot.slane %v5717_v10, %v6759_v1  ;;  %v6825_v53 = vrot.slane %v5719_v11, %v6759_v1  ;;  %v999_v19 = vpop.permute.xlu1 %998  ;;  %v6827_v20 = vpop.permute.xlu0 %1004 }
 0x2e7   :  { %v1188_v21 = vrot.slane %v1180_v14, %v6759_v1  ;;  %v1195_v22 = vrot.slane %v1181_v15, %v6759_v1  ;;  %v1044_v23 = vcombine.low %v987_v42, %v999_v19  ;;  %v1045_v24 = vcombine.high %v987_v42, %v999_v19 }
 0x2e8   :  { %v792_v25 = vcombine.low %v6816_v16, %v6819_v17  ;;  %v793_v26 = vcombine.high %v6816_v16, %v6819_v17  ;;  %v824_v27 = vcombine.low %v6822_v18, %v6825_v53  ;;  %v825_v28 = vcombine.high %v6822_v18, %v6825_v53 }
 0x2e9   :  { %v1228_v29 = vcombine.low %v1172_v4, %v1188_v21  ;;  %v1229_v30 = vcombine.high %v1172_v4, %v1188_v21  ;;  %v1244_v31 = vcombine.low %v1179_v52, %v1195_v22  ;;  %v1245_v32 = vcombine.high %v1179_v52, %v1195_v22 }
 0x2ea   :  { %v1052_v33 = vrot.slane %v1044_v23, %v6759_v1  ;;  %v1059_v34 = vrot.slane %v1045_v24, %v6759_v1  ;;  %v6841_v37 = vpop.permute.xlu1 %400  ;;  %v1017_v38 = vpop.permute.xlu0 %1016  ;;  %v840_v39 = vcombine.low %v6800_v59, %v6803_v60  ;;  %v6846_v40 = vrot.slane %v777_v44, %v6763_v8 }
 0x2eb   :  { %v1236_v41 = vrot.slane %v1228_v29, %v6763_v8  ;;  %v1243_v42 = vrot.slane %v1229_v30, %v6763_v8  ;;  %v1252_v43 = vrot.slane %v1244_v31, %v6763_v8  ;;  %v1259_v45 = vrot.slane %v1245_v32, %v6763_v8 }
 0x2ec   :  { %v1092_v47 = vcombine.low %v1036_v12, %v1052_v33  ;;  %v1093_v50 = vcombine.high %v1036_v12, %v1052_v33  ;;  %v1108_v55 = vcombine.low %v1043_v13, %v1059_v34  ;;  %v1109_v56 = vcombine.high %v1043_v13, %v1059_v34 }
 0x2ed   :  { %v5736_v57 = vcombine.low %v1236_v41, %v1243_v42  ;;  %v5738_v58 = vcombine.high %v1236_v41, %v1243_v42  ;;  %v5740_v61 = vcombine.low %v1252_v43, %v1259_v45  ;;  %v5742_v62 = vcombine.high %v1252_v43, %v1259_v45 }
 0x2ee   :  { %v1100_v63 = vrot.slane %v1092_v47, %v6763_v8  ;;  %v1107_v44 = vrot.slane %v1093_v50, %v6763_v8  ;;  %v1116_v0 = vrot.slane %v1108_v55, %v6763_v8  ;;  %v1123_v2 = vrot.slane %v1109_v56, %v6763_v8  ;;  %v1011_v3 = vpop.permute.xlu1 %1010  ;;  %v407_v4 = vpop.permute.xlu0 %406 }
 0x2ef   :  { %v6857_v52 = vrot.slane %v5736_v57, %v6759_v1  ;;  %v6860_v5 = vrot.slane %v5738_v58, %v6759_v1  ;;  %v6863_v6 = vrot.slane %v5740_v61, %v6759_v1  ;;  %v6866_v7 = vrot.slane %v5742_v62, %v6759_v1 }
 0x2f0   :  { %v5728_v9 = vcombine.low %v1100_v63, %v1107_v44  ;;  %v5730_v10 = vcombine.high %v1100_v63, %v1107_v44  ;;  %v5732_v11 = vcombine.low %v1116_v0, %v1123_v2  ;;  %v5734_v12 = vcombine.high %v1116_v0, %v1123_v2 }
 0x2f1   :  { %v1500_v13 = vcombine.low %v6857_v52, %v6860_v5  ;;  %v1501_v14 = vcombine.high %v6857_v52, %v6860_v5  ;;  %v1532_v15 = vcombine.low %v6863_v6, %v6866_v7  ;;  %v1533_v19 = vcombine.high %v6863_v6, %v6866_v7 }
 0x2f2   :  { %v1308_v21 = vrot.slane %v5728_v9, %v6759_v1  ;;  %v1324_v22 = vrot.slane %v5730_v10, %v6759_v1  ;;  %v6879_v23 = vrot.slane %v5732_v11, %v6759_v1  ;;  %v6882_v24 = vrot.slane %v5734_v12, %v6759_v1  ;;  %v1023_v29 = vpop.permute.xlu1 %1022  ;;  %v1007_v30 = vpop.permute.xlu0 %1006 }
 0x2f3   :  { %v1060_v31 = vcombine.low %v6827_v20, %v1017_v38  ;;  %v1061_v32 = vcombine.high %v6827_v20, %v1017_v38  ;;  %v576_v33 = vcombine.low %v6669_v48, %v407_v4  ;;  %v577_v34 = vcombine.high %v6669_v48, %v407_v4 }
 0x2f4   :  { %v1364_v41 = vcombine.low %v1308_v21, %v1324_v22  ;;  %v1365_v42 = vcombine.high %v1308_v21, %v1324_v22  ;;  %v1396_v43 = vcombine.low %v6879_v23, %v6882_v24  ;;  %v1397_v45 = vcombine.high %v6879_v23, %v6882_v24 }
 0x2f5   :  { %v1068_v47 = vrot.slane %v1060_v31, %v6759_v1  ;;  %v1075_v50 = vrot.slane %v1061_v32, %v6759_v1  ;;  %v584_v55 = vrot.slane %v576_v33, %v6759_v1  ;;  %v591_v20 = vrot.slane %v577_v34, %v6759_v1 }
 0x2f6   :  { %v1076_v38 = vcombine.low %v1011_v3, %v1023_v29  ;;  %v1077_v56 = vcombine.high %v1011_v3, %v1023_v29  ;;  %v413_v57 = vpop.permute.xlu1 %412  ;;  %v1019_v48 = vpop.permute.xlu0 %1018  ;;  %v6897_v58 = vrot.slane %v1364_v41, %v6763_v8  ;;  %v6900_v61 = vrot.slane %v1396_v43, %v6763_v8 }
 0x2f7   :  { %v592_v62 = vcombine.low %v6841_v37, %v413_v57  ;;  %v593_v63 = vcombine.high %v6841_v37, %v413_v57  ;;  %v1196_v44 = vcombine.low %v1007_v30, %v1019_v48  ;;  %v1197_v0 = vcombine.high %v1007_v30, %v1019_v48 }
 0x2f8   :  { %v1084_v2 = vrot.slane %v1076_v38, %v6759_v1  ;;  %v1091_v4 = vrot.slane %v1077_v56, %v6759_v1  ;;  %v1428_v3 = vcombine.low %v6897_v58, %v6900_v61  ;;  %v6909_v9 = vrot.slane %v1365_v42, %v6763_v8 }
 0x2f9   :  { %v600_v10 = vrot.slane %v592_v62, %v6759_v1  ;;  %v607_v11 = vrot.slane %v593_v63, %v6759_v1  ;;  %v6914_v12 = vrot.slane %v1196_v44, %v6759_v1  ;;  %v6917_v37 = vrot.slane %v1197_v0, %v6759_v1 }
 0x2fa   :  { %v1124_v21 = vcombine.low %v1068_v47, %v1084_v2  ;;  %v1125_v22 = vcombine.high %v1068_v47, %v1084_v2  ;;  %v1140_v29 = vcombine.low %v1075_v50, %v1091_v4  ;;  %v1141_v30 = vcombine.high %v1075_v50, %v1091_v4  ;;  %5972 = vmatpush3.xpose.msk.msra.mxu1 %vm2160_vm2, %v1428_v3  ;;  %v1013_v31 = vpop.permute.xlu1 %1012  ;;  %v419_v47 = vpop.permute.xlu0 %418 }
 0x2fb   :  { %v640_v32 = vcombine.low %v584_v55, %v600_v10  ;;  %v641_v33 = vcombine.high %v584_v55, %v600_v10  ;;  %v656_v34 = vcombine.low %v591_v20, %v607_v11  ;;  %v657_v41 = vcombine.high %v591_v20, %v607_v11  ;;  %5976 = vmatprep.subr.mxu1 %v6457_v54 }
 0x2fc   :  { %v1132_v42 = vrot.slane %v1124_v21, %v6763_v8  ;;  %v1139_v43 = vrot.slane %v1125_v22, %v6763_v8  ;;  %v1148_v38 = vrot.slane %v1140_v29, %v6763_v8  ;;  %v1155_v56 = vrot.slane %v1141_v30, %v6763_v8 }
 0x2fd   :  { %v648_v50 = vrot.slane %v640_v32, %v6763_v8  ;;  %v655_v57 = vrot.slane %v641_v33, %v6763_v8  ;;  %v664_v48 = vrot.slane %v656_v34, %v6763_v8  ;;  %v671_v55 = vrot.slane %v657_v41, %v6763_v8  ;;  %5974 = vmatmul.mubr.msk.f32.vlgmr.msra.gmra.mrb[4].mxu1 %vm2160_vm2, %v840_v39 }
 0x2fe   :  { %v5729_v20 = vcombine.low %v1132_v42, %v1139_v43  ;;  %v5731_v62 = vcombine.high %v1132_v42, %v1139_v43  ;;  %v5733_v63 = vcombine.low %v1148_v38, %v1155_v56  ;;  %v5735_v44 = vcombine.high %v1148_v38, %v1155_v56  ;;  %v1025_v0 = vpop.permute.xlu1 %1024  ;;  %5978 = vmatprep.mubr.msk.f32.mxu1 %vm6458_vm1, %v6457_v54  ;;  %v431_v38 = vpop.permute.xlu0 %430 }
 0x2ff   :  { %v5720_v2 = vcombine.low %v648_v50, %v655_v57  ;;  %v5722_v4 = vcombine.high %v648_v50, %v655_v57  ;;  %v5724_v3 = vcombine.low %v664_v48, %v671_v55  ;;  %v5726_v10 = vcombine.high %v664_v48, %v671_v55 }
 0x300   :  { %v6936_v11 = vrot.slane %v5729_v20, %v6759_v1  ;;  %v6939_v21 = vrot.slane %v5731_v62, %v6759_v1  ;;  %v6942_v39 = vrot.slane %v5733_v63, %v6759_v1  ;;  %v6945_v22 = vrot.slane %v5735_v44, %v6759_v1 }
 0x301   :  { %v6948_v29 = vrot.slane %v5720_v2, %v6759_v1  ;;  %v6951_v30 = vrot.slane %v5722_v4, %v6759_v1  ;;  %v6954_v32 = vrot.slane %v5724_v3, %v6759_v1  ;;  %v6957_v33 = vrot.slane %v5726_v10, %v6759_v1 }
 0x302   :  { %v1380_v34 = vcombine.low %v6936_v11, %v6939_v21  ;;  %v1381_v41 = vcombine.high %v6936_v11, %v6939_v21  ;;  %v1412_v42 = vcombine.low %v6942_v39, %v6945_v22  ;;  %v1413_v43 = vcombine.high %v6942_v39, %v6945_v22  ;;  %v425_v56 = vpop.permute.xlu1 %424 }
 0x303   :  { %v912_v50 = vcombine.low %v6948_v29, %v6951_v30  ;;  %v913_v57 = vcombine.high %v6948_v29, %v6951_v30  ;;  %v944_v48 = vcombine.low %v6954_v32, %v6957_v33  ;;  %v1411_v20 = vrot.slane %v1397_v45, %v6763_v8 }
 0x304   :  { %v823_v62 = vrot.slane %v809_v46, %v6763_v8  ;;  %v1429_v63 = vcombine.high %v6897_v58, %v6900_v61  ;;  %v1212_v44 = vcombine.low %v1013_v31, %v1025_v0  ;;  %v1213_v2 = vcombine.high %v1013_v31, %v1025_v0 }
 0x305   :  { %v608_v4 = vcombine.low %v419_v47, %v431_v38  ;;  %v609_v3 = vcombine.high %v419_v47, %v431_v38  ;;  %v841_v10 = vcombine.high %v6800_v59, %v6803_v60  ;;  %v1430_v55 = vcombine.low %v6909_v9, %v1411_v20 }
 0x306   :  { %v842_v23 = vcombine.low %v6846_v40, %v823_v62  ;;  %5977 = vmatpush3.xpose.msk.msra.mxu1 %vm2160_vm2, %v1429_v63  ;;  %v1220_v24 = vrot.slane %v1212_v44, %v6759_v1  ;;  %v1431_v35 = vcombine.high %v6909_v9, %v1411_v20  ;;  %v437_v36 = vpop.permute.xlu1 %436  ;;  %v1227_v46 = vrot.slane %v1213_v2, %v6759_v1 }
 0x307   :  { %v616_v45 = vrot.slane %v608_v4, %v6759_v1  ;;  %v623_v58 = vrot.slane %v609_v3, %v6759_v1  ;;  %5986 = vmatprep.subr.mxu1 %v6457_v54  ;;  %v843_v59 = vcombine.high %v6846_v40, %v823_v62  ;;  %5982 = vmatpush3.xpose.msk.msra.mxu0 %vm2160_vm2, %v1430_v55 }
 0x308   :  { %v1260_v60 = vcombine.low %v6914_v12, %v1220_v24  ;;  %v1261_v61 = vcombine.high %v6914_v12, %v1220_v24  ;;  %v1388_v31 = vrot.slane %v1380_v34, %v6763_v8  ;;  %v1420_v9 = vrot.slane %v1412_v42, %v6763_v8  ;;  %5991 = vmatprep.subr.mxu0 %v6457_v54 }
 0x309   :  { %v1276_v47 = vcombine.low %v6917_v37, %v1227_v46  ;;  %v1277_v0 = vcombine.high %v6917_v37, %v1227_v46  ;;  %5979 = vmatmul.mubr.msk.f32.vlgmr.msra.gmra.mrb[6].mxu1 %vm2160_vm2, %v841_v10  ;;  %v624_v38 = vcombine.low %v425_v56, %v437_v36  ;;  %v625_v63 = vcombine.high %v425_v56, %v437_v36 }
 0x30a   :  { %v1268_v40 = vrot.slane %v1260_v60, %v6763_v8  ;;  %v1275_v55 = vrot.slane %v1261_v61, %v6763_v8  ;;  %5987 = vmatpush3.xpose.msk.msra.mxu1 %vm2160_vm2, %v1431_v35  ;;  %5988 = vmatprep.mubr.msk.f32.mxu1 %vm6458_vm1, %v6457_v54  ;;  %v1432_v12 = vcombine.low %v1388_v31, %v1420_v9  ;;  %v1581_v10 = vpop.permute.xlu1 %1580 }
 0x30b   :  { %5984 = vmatmul.mubr.msk.f32.vlgmr.msra.gmra.mrb[2].mxu0 %vm2160_vm2, %v842_v23  ;;  %v1284_v34 = vrot.slane %v1276_v47, %v6763_v8  ;;  %v1291_v37 = vrot.slane %v1277_v0, %v6763_v8  ;;  %5996 = vmatprep.subr.mxu1 %v6457_v54  ;;  %v1433_v42 = vcombine.high %v1388_v31, %v1420_v9 }
 0x30c   :  { %v5737_v20 = vcombine.low %v1268_v40, %v1275_v55  ;;  %v5739_v62 = vcombine.high %v1268_v40, %v1275_v55  ;;  %5992 = vmatpush3.xpose.msk.msra.mxu0 %vm2160_vm2, %v1432_v12  ;;  %v632_v44 = vrot.slane %v624_v38, %v6759_v1  ;;  %5993 = vmatprep.mubr.msk.f32.mxu0 %vm6458_vm1, %v6457_v54 }
 0x30d   :  { %v5741_v2 = vcombine.low %v1284_v34, %v1291_v37  ;;  %v5743_v4 = vcombine.high %v1284_v34, %v1291_v37  ;;  %5989 = vmatmul.mubr.msk.f32.vlgmr.msra.gmra.mrb[8].mxu1 %vm2160_vm2, %v843_v59  ;;  %v800_v3 = vrot.slane %v792_v25, %v6763_v8  ;;  %v639_v24 = vrot.slane %v625_v63, %v6759_v1 }
 0x30e   :  { %v7025_v23 = vrot.slane %v5737_v20, %v6759_v1  ;;  %v7028_v56 = vrot.slane %v5739_v62, %v6759_v1  ;;  %5997 = vmatpush3.xpose.msk.msra.mxu1 %vm2160_vm2, %v1433_v42  ;;  %v672_v35 = vcombine.low %v616_v45, %v632_v44  ;;  %v673_v59 = vcombine.high %v616_v45, %v632_v44  ;;  %v1587_v20 = vpop.permute.xlu1 %1586 }
 0x30f   :  { %v7033_v36 = vrot.slane %v5741_v2, %v6759_v1  ;;  %v7036_v46 = vrot.slane %v5743_v4, %v6759_v1  ;;  %5998 = vmatprep.mubr.msk.f32.mxu1 %vm6458_vm1, %v6457_v54  ;;  %v832_v25 = vrot.slane %v824_v27, %v6763_v8  ;;  %v688_v9 = vcombine.low %v623_v58, %v639_v24 }
 0x310   :  { %v1516_v60 = vcombine.low %v7025_v23, %v7028_v56  ;;  %v1517_v61 = vcombine.high %v7025_v23, %v7028_v56  ;;  %v680_v31 = vrot.slane %v672_v35, %v6763_v8  ;;  %6001 = vmatprep.subr.mxu0 %v6457_v54  ;;  %v687_v0 = vrot.slane %v673_v59, %v6763_v8 }
 0x311   :  { %v1548_v45 = vcombine.low %v7033_v36, %v7036_v46  ;;  %v1549_v47 = vcombine.high %v7033_v36, %v7036_v46  ;;  %v689_v27 = vcombine.high %v623_v58, %v639_v24  ;;  %6006 = vmatprep.subr.mxu1 %v6457_v54  ;;  %v696_v38 = vrot.slane %v688_v9, %v6763_v8 }
 0x312   :  { %v844_v40 = vcombine.low %v800_v3, %v832_v25  ;;  %v845_v55 = vcombine.high %v800_v3, %v832_v25  ;;  %v1395_v12 = vrot.slane %v1381_v41, %v6763_v8  ;;  %v5721_v37 = vcombine.low %v680_v31, %v687_v0  ;;  %v1575_v3 = vpop.permute.xlu0 %1574  ;;  %v7116_v53 = vpop.permute.xlu1 %1592 }
 0x313   :  { %v703_v34 = vrot.slane %v689_v27, %v6763_v8  ;;  %v5723_v42 = vcombine.high %v680_v31, %v687_v0  ;;  %v1427_v58 = vrot.slane %v1413_v43, %v6763_v8  ;;  %v1616_v62 = vcombine.low %v6675_v51, %v1581_v10 }
 0x314   :  { %5994 = vmatmul.mubr.msk.f32.vlgmr.msra.gmra.mrb[4].mxu0 %vm2160_vm2, %v844_v40  ;;  %5999 = vmatmul.mubr.msk.f32.vlgmr.msra.gmra.mrb[10].mxu1 %vm2160_vm2, %v845_v55  ;;  %v1617_v63 = vcombine.high %v6675_v51, %v1581_v10  ;;  %v807_v11 = vrot.slane %v793_v26, %v6763_v8  ;;  %v7075_v21 = vrot.slane %v5721_v37, %v6759_v1 }
 0x315   :  { %v7078_v39 = vrot.slane %v5723_v42, %v6759_v1  ;;  %v5725_v22 = vcombine.low %v696_v38, %v703_v34  ;;  %v5727_v41 = vcombine.high %v696_v38, %v703_v34  ;;  %6003 = vmatprep.mubr.msk.f32.mxu0 %vm6458_vm1, %v6457_v54  ;;  %v1434_v43 = vcombine.low %v1395_v12, %v1427_v58 }
 0x316   :  { %v1435_v44 = vcombine.high %v1395_v12, %v1427_v58  ;;  %v1624_v51 = vrot.slane %v1616_v62, %v6759_v1  ;;  %v1631_v2 = vrot.slane %v1617_v63, %v6759_v1  ;;  %6008 = vmatprep.mubr.msk.f32.mxu1 %vm6458_vm1, %v6457_v54  ;;  %v839_v10 = vrot.slane %v825_v28, %v6763_v8  ;;  %v1605_v30 = vpop.permute.xlu1 %1604 }
 0x317   :  { %v7087_v16 = vrot.slane %v5725_v22, %v6759_v1  ;;  %v7090_v17 = vrot.slane %v5727_v41, %v6759_v1  ;;  %v928_v26 = vcombine.low %v7075_v21, %v7078_v39  ;;  %v929_v4 = vcombine.high %v7075_v21, %v7078_v39  ;;  %6002 = vmatpush3.xpose.msk.msra.mxu0 %vm2160_vm2, %v1434_v43 }
 0x318   :  { %6007 = vmatpush3.xpose.msk.msra.mxu1 %vm2160_vm2, %v1435_v44  ;;  %v1508_v24 = vrot.slane %v1500_v13, %v6763_v8  ;;  %v1540_v35 = vrot.slane %v1532_v15, %v6763_v8  ;;  %6011 = vmatprep.subr.mxu0 %v6457_v54  ;;  %v1632_v18 = vcombine.low %v1575_v3, %v1587_v20 }
 0x319   :  { %v960_v59 = vcombine.low %v7087_v16, %v7090_v17  ;;  %v961_v25 = vcombine.high %v7087_v16, %v7090_v17  ;;  %6016 = vmatprep.subr.mxu1 %v6457_v54  ;;  %v846_v28 = vcombine.low %v807_v11, %v839_v10  ;;  %v847_v13 = vcombine.high %v807_v11, %v839_v10 }
 0x31a   :  { %v1564_v31 = vcombine.low %v1508_v24, %v1540_v35  ;;  %v1565_v9 = vcombine.high %v1508_v24, %v1540_v35  ;;  %v1633_v0 = vcombine.high %v1575_v3, %v1587_v20  ;;  %v1640_v15 = vrot.slane %v1632_v18, %v6759_v1  ;;  %v1611_v35 = vpop.permute.xlu1 %1610 }
 0x31b   :  { %v920_v27 = vrot.slane %v912_v50, %v6763_v8  ;;  %v952_v38 = vrot.slane %v944_v48, %v6763_v8  ;;  %6004 = vmatmul.mubr.msk.f32.vlgmr.msra.gmra.mrb[6].mxu0 %vm2160_vm2, %v846_v28  ;;  %6009 = vmatmul.mubr.msk.f32.vlgmr.msra.gmra.mrb[12].mxu1 %vm2160_vm2, %v847_v13  ;;  %v1515_v40 = vrot.slane %v1501_v14, %v6763_v8 }
 0x31c   :  { %v1547_v55 = vrot.slane %v1533_v19, %v6763_v8  ;;  %v927_v50 = vrot.slane %v913_v57, %v6763_v8  ;;  %6012 = vmatpush3.xpose.msk.msra.mxu0 %vm2160_vm2, %v1564_v31  ;;  %6017 = vmatpush3.xpose.msk.msra.mxu1 %vm2160_vm2, %v1565_v9  ;;  %v1647_v48 = vrot.slane %v1633_v0, %v6759_v1  ;;  %v1599_v31 = vpop.permute.xlu0 %1598 }
 0x31d   :  { %v1680_v12 = vcombine.low %v1624_v51, %v1640_v15  ;;  %v1681_v34 = vcombine.high %v1624_v51, %v1640_v15  ;;  %6013 = vmatprep.mubr.msk.f32.mxu0 %vm6458_vm1, %v6457_v54  ;;  %6018 = vmatprep.mubr.msk.f32.mxu1 %vm6458_vm1, %v6457_v54  ;;  %v976_v52 = vcombine.low %v920_v27, %v952_v38 }
 0x31e   :  { %v977_v5 = vcombine.high %v920_v27, %v952_v38  ;;  %v1566_v6 = vcombine.low %v1515_v40, %v1547_v55  ;;  %v1696_v19 = vcombine.low %v1631_v2, %v1647_v48  ;;  %v1697_v29 = vcombine.high %v1631_v2, %v1647_v48  ;;  %6021 = vmatprep.subr.mxu0 %v6457_v54 }
 0x31f   :  { %v1688_v7 = vrot.slane %v1680_v12, %v6763_v8  ;;  %v1695_v14 = vrot.slane %v1681_v34, %v6763_v8  ;;  %6014 = vmatmul.mubr.msk.f32.vlgmr.msra.gmra.mrb[8].mxu0 %vm2160_vm2, %v976_v52  ;;  %v1567_v57 = vcombine.high %v1515_v40, %v1547_v55  ;;  %v7826_v37 = vcombine.high %v6954_v32, %v6957_v33 }
 0x320   :  { %6019 = vmatmul.mubr.msk.f32.vlgmr.msra.gmra.mrb[14].mxu1 %vm2160_vm2, %v977_v5  ;;  %v1524_v58 = vrot.slane %v1516_v60, %v6763_v8  ;;  %v1704_v20 = vrot.slane %v1696_v19, %v6763_v8  ;;  %v1711_v62 = vrot.slane %v1697_v29, %v6763_v8  ;;  %6026 = vmatprep.subr.mxu1 %v6457_v54 }
 0x321   :  { %v959_v42 = vrot.slane %v7826_v37, %v6763_v8  ;;  %v5744_v63 = vcombine.low %v1688_v7, %v1695_v14  ;;  %v5746_v11 = vcombine.high %v1688_v7, %v1695_v14  ;;  %6022 = vmatpush3.xpose.msk.msra.mxu0 %vm2160_vm2, %v1566_v6  ;;  %6027 = vmatpush3.xpose.msk.msra.mxu1 %vm2160_vm2, %v1567_v57 }
 0x322   :  { %v1556_v33 = vrot.slane %v1548_v45, %v6763_v8  ;;  %v5748_v43 = vcombine.low %v1704_v20, %v1711_v62  ;;  %v5750_v44 = vcombine.high %v1704_v20, %v1711_v62  ;;  %6023 = vmatprep.mubr.msk.f32.mxu0 %vm6458_vm1, %v6457_v54  ;;  %6028 = vmatprep.mubr.msk.f32.mxu1 %vm6458_vm1, %v6457_v54 }
 0x323   :  { %v978_v22 = vcombine.low %v927_v50, %v959_v42  ;;  %v979_v32 = vcombine.high %v927_v50, %v959_v42  ;;  %v7171_v60 = vrot.slane %v5744_v63, %v6759_v1  ;;  %v7174_v41 = vrot.slane %v5746_v11, %v6759_v1  ;;  %6031 = vmatprep.subr.mxu0 %v6457_v54 }
 0x324   :  { %v1568_v51 = vcombine.low %v1524_v58, %v1556_v33  ;;  %v1569_v2 = vcombine.high %v1524_v58, %v1556_v33  ;;  %v1648_v45 = vcombine.low %v7116_v53, %v1605_v30  ;;  %v7183_v3 = vrot.slane %v5748_v43, %v6759_v1  ;;  %6036 = vmatprep.subr.mxu1 %v6457_v54 }
 0x325   :  { %v7186_v10 = vrot.slane %v5750_v44, %v6759_v1  ;;  %6024 = vmatmul.mubr.msk.f32.vlgmr.msra.gmra.mrb[10].mxu0 %vm2160_vm2, %v978_v22  ;;  %6029 = vmatmul.mubr.msk.f32.vlgmr.msra.gmra.mrb[16].mxu1 %vm2160_vm2, %v979_v32  ;;  %v1649_v24 = vcombine.high %v7116_v53, %v1605_v30  ;;  %v936_v28 = vrot.slane %v928_v26, %v6763_v8 }
 0x326   :  { %6032 = vmatpush3.xpose.msk.msra.mxu0 %vm2160_vm2, %v1568_v51  ;;  %v1656_v18 = vrot.slane %v1648_v45, %v6759_v1  ;;  %v968_v13 = vrot.slane %v960_v59, %v6763_v8  ;;  %6037 = vmatpush3.xpose.msk.msra.mxu1 %vm2160_vm2, %v1569_v2  ;;  %v1531_v9 = vrot.slane %v1517_v61, %v6763_v8 }
 0x327   :  { %v1663_v53 = vrot.slane %v1649_v24, %v6759_v1  ;;  %6033 = vmatprep.mubr.msk.f32.mxu0 %vm6458_vm1, %v6457_v54  ;;  %v1563_v26 = vrot.slane %v1549_v47, %v6763_v8  ;;  %6038 = vmatprep.mubr.msk.f32.mxu1 %vm6458_vm1, %v6457_v54  ;;  %v1664_v15 = vcombine.low %v1599_v31, %v1611_v35 }
 0x328   :  { %6041 = vmatprep.subr.mxu0 %v6457_v54  ;;  %v980_v59 = vcombine.low %v936_v28, %v968_v13  ;;  %v981_v0 = vcombine.high %v936_v28, %v968_v13  ;;  %6046 = vmatprep.subr.mxu1 %v6457_v54  ;;  %v1665_v40 = vcombine.high %v1599_v31, %v1611_v35  ;;  %v105_v35 = vld [vmem:[#allocation5] sm:$0xff] }
 0x329   :  { %v1570_v27 = vcombine.low %v1531_v9, %v1563_v26  ;;  %v1571_v38 = vcombine.high %v1531_v9, %v1563_v26  ;;  %v943_v23 = vrot.slane %v929_v4, %v6763_v8  ;;  %v1672_v56 = vrot.slane %v1664_v15, %v6759_v1 }
 0x32a   :  { %6034 = vmatmul.mubr.msk.f32.vlgmr.msra.gmra.mrb[12].mxu0 %vm2160_vm2, %v980_v59  ;;  %6039 = vmatmul.mubr.msk.f32.vlgmr.msra.gmra.mrb[18].mxu1 %vm2160_vm2, %v981_v0  ;;  %v975_v36 = vrot.slane %v961_v25, %v6763_v8  ;;  %v1952_v46 = vcombine.low %v7171_v60, %v7174_v41  ;;  %v1679_v61 = vrot.slane %v1665_v40, %v6759_v1  ;;  %vm3377_vm3 = vcmp.ne.s32.totalorder %v105_v35, 0 }
 0x32b   :  { %6042 = vmatpush3.xpose.msk.msra.mxu0 %vm2160_vm2, %v1570_v27  ;;  %6047 = vmatpush3.xpose.msk.msra.mxu1 %vm2160_vm2, %v1571_v38  ;;  %v1984_v47 = vcombine.low %v7183_v3, %v7186_v10  ;;  %v1953_v21 = vcombine.high %v7171_v60, %v7174_v41  ;;  %v1712_v39 = vcombine.low %v1656_v18, %v1672_v56 }
 0x32c   :  { %v1713_v4 = vcombine.high %v1656_v18, %v1672_v56  ;;  %6043 = vmatprep.mubr.msk.f32.mxu0 %vm6458_vm1, %v6457_v54  ;;  %6048 = vmatprep.mubr.msk.f32.mxu1 %vm6458_vm1, %v6457_v54  ;;  %v982_v16 = vcombine.low %v943_v23, %v975_v36  ;;  %v1728_v17 = vcombine.low %v1663_v53, %v1679_v61 }
 0x32d   :  { %v1729_v25 = vcombine.high %v1663_v53, %v1679_v61  ;;  %v983_v55 = vcombine.high %v943_v23, %v975_v36  ;;  %6051 = vmatprep.subr.mxu0 %v6457_v54  ;;  %6056 = vmatprep.subr.mxu1 %v6457_v54  ;;  %v1720_v50 = vrot.slane %v1712_v39, %v6763_v8 }
 0x32e   :  { %v1727_v48 = vrot.slane %v1713_v4, %v6763_v8  ;;  %6044 = vmatmul.mubr.msk.f32.vlgmr.msra.gmra.mrb[14].mxu0 %vm2160_vm2, %v982_v16  ;;  %v1960_v12 = vrot.slane %v1952_v46, %v6763_v8  ;;  %v1992_v34 = vrot.slane %v1984_v47, %v6763_v8  ;;  %v1736_v52 = vrot.slane %v1728_v17, %v6763_v8 }
 0x32f   :  { %v1743_v5 = vrot.slane %v1729_v25, %v6763_v8  ;;  %6049 = vmatmul.mubr.msk.f32.vlgmr.msra.gmra.mrb[20].mxu1 %vm2160_vm2, %v983_v55  ;;  %6053 = vmatprep.mubr.msk.f32.mxu0 %vm6458_vm1, %v6457_v54  ;;  %v7257_v57 = vrot.slane %v1953_v21, %v6763_v8  ;;  %v1985_v37 = vcombine.high %v7183_v3, %v7186_v10  ;;  %v106_v25 = vld [vmem:[#allocation5 + $0x8] sm:$0xff] }
 0x330   :  { %v5745_v6 = vcombine.low %v1720_v50, %v1727_v48  ;;  %v5747_v7 = vcombine.high %v1720_v50, %v1727_v48  ;;  %v2016_v14 = vcombine.low %v1960_v12, %v1992_v34  ;;  %v2017_v19 = vcombine.high %v1960_v12, %v1992_v34  ;;  %6058 = vmatprep.mubr.msk.f32.mxu1 %vm6458_vm1, %v6457_v54 }
 0x331   :  { %v5749_v29 = vcombine.low %v1736_v52, %v1743_v5  ;;  %v5751_v30 = vcombine.high %v1736_v52, %v1743_v5  ;;  %v7267_v63 = vrot.slane %v1985_v37, %v6763_v8  ;;  %vm3378_vm5 = vcmp.ne.s32.totalorder %v106_v25, 0 }
 0x332   :  { %v1903_v42 = vrot.slane %v5745_v6, %v6759_v1  ;;  %v1919_v58 = vrot.slane %v5747_v7, %v6759_v1  ;;  %6052 = vmatpush3.msra.mxu0 %v2016_v14  ;;  %6057 = vmatpush3.msra.mxu1 %v2017_v19 }
 0x333   :  { %v1935_v20 = vrot.slane %v5749_v29, %v6759_v1  ;;  %v1951_v62 = vrot.slane %v5751_v30, %v6759_v1  ;;  %6061 = vmatprep.subr.mxu0 %v6457_v54  ;;  %6066 = vmatprep.subr.mxu1 %v6457_v54  ;;  %v2018_v32 = vcombine.low %v7257_v57, %v7267_v63 }
 0x334   :  { %v1968_v11 = vcombine.low %v1903_v42, %v1919_v58  ;;  %v1969_v22 = vcombine.high %v1903_v42, %v1919_v58  ;;  %v2019_v33 = vcombine.high %v7257_v57, %v7267_v63 }
 0x335   :  { %v2000_v60 = vcombine.low %v1935_v20, %v1951_v62  ;;  %v2001_v41 = vcombine.high %v1935_v20, %v1951_v62 }
 0x336   :  { %v7275_v43 = vrot.slane %v1968_v11, %v6763_v8  ;;  %v7278_v44 = vrot.slane %v1969_v22, %v6763_v8 }
 0x337   :  { %v7281_v51 = vrot.slane %v2000_v60, %v6763_v8  ;;  %v7284_v2 = vrot.slane %v2001_v41, %v6763_v8 }
 0x339   :  { %v2020_v45 = vcombine.low %v7275_v43, %v7281_v51  ;;  %v2022_v3 = vcombine.low %v7278_v44, %v7284_v2  ;;  %v2021_v10 = vcombine.high %v7275_v43, %v7281_v51  ;;  %v2023_v24 = vcombine.high %v7278_v44, %v7284_v2 }
 0x3d0   :  { %v2233_v18 = vpop.f32.mrb[4].mxu1 }
 0x3d1   :  { %v7295_v28 = vsel %vm3377_vm3, -1e+09, %v2233_v18  ;;  %v5975_v13 = vpop.f32.mrb[5].mxu1 }
 0x3d2   :  { %v3396_v31 = vsel %vm3395_vm4, %v7295_v28, -inf }
 0x3d3   :  { %3397 = vmax.xlane.f32.xlu0 %v3396_v31 }
 0x3dc   :  { %v2309_v53 = vpop.f32.mrb[6].mxu1 }
 0x3dd   :  { %v7300_v9 = vsel %vm3377_vm3, -1e+09, %v2309_v53  ;;  %v5980_v26 = vpop.f32.mrb[7].mxu1 }
 0x3de   :  { %v2385_v59 = vpop.f32.mrb[2].mxu0  ;;  %v3399_v0 = vsel %vm3395_vm4, %v7300_v9, -inf }
 0x3df   :  { %v7305_v15 = vsel %vm3377_vm3, -1e+09, %v2385_v59  ;;  %v5985_v27 = vpop.f32.mrb[3].mxu0  ;;  %3400 = vmax.xlane.f32.xlu1 %v3399_v0 }
 0x3e0   :  { %v3402_v38 = vsel %vm3395_vm4, %v7305_v15, -inf  ;;  %v2461_v40 = vpop.f32.mrb[8].mxu1 }
 0x3e1   :  { %3403 = vmax.xlane.f32.xlu0 %v3402_v38  ;;  %v5990_v23 = vpop.f32.mrb[9].mxu1  ;;  %v7320_v16 = vsel %vm3377_vm3, -1e+09, %v2461_v40 }
 0x3e2   :  { %v3405_v17 = vsel %vm3395_vm4, %v7320_v16, -inf }
 0x3e7   :  { %v2537_v56 = vpop.f32.mrb[4].mxu0  ;;  %v2613_v36 = vpop.f32.mrb[10].mxu1 }
 0x3e8   :  { %v7310_v46 = vsel %vm3377_vm3, -1e+09, %v2537_v56  ;;  %v7313_v61 = vsel %vm3377_vm3, -1e+09, %v2613_v36  ;;  %v5995_v47 = vpop.f32.mrb[5].mxu0  ;;  %v6000_v21 = vpop.f32.mrb[11].mxu1 }
 0x3e9   :  { %v3411_v39 = vsel %vm3395_vm4, %v7313_v61, -inf  ;;  %v3408_v4 = vsel %vm3395_vm4, %v7310_v46, -inf }
 0x3ea   :  { %3412 = vmax.xlane.f32.xlu1 %v3411_v39  ;;  %3409 = vmax.xlane.f32.xlu0 %v3408_v4 }
 0x3ee   :  { %3406 = vmax.xlane.f32.xlu0 %v3405_v17  ;;  %v2689_v55 = vpop.f32.mrb[6].mxu0  ;;  %v2765_v50 = vpop.f32.mrb[12].mxu1 }
 0x3ef   :  { %v7325_v48 = vsel %vm3377_vm3, -1e+09, %v2689_v55  ;;  %v7328_v12 = vsel %vm3377_vm3, -1e+09, %v2765_v50  ;;  %v6005_v34 = vpop.f32.mrb[7].mxu0  ;;  %v6010_v52 = vpop.f32.mrb[13].mxu1 }
 0x3f0   :  { %v3417_v5 = vsel %vm3395_vm4, %v7328_v12, -inf  ;;  %v3414_v6 = vsel %vm3395_vm4, %v7325_v48, -inf  ;;  %v7379_v34 = vpop.permute.xlu1 %1576 }
 0x3f1   :  { %3418 = vmax.xlane.f32.xlu1 %v3417_v5 }
 0x3f2   :  { %3415 = vmax.xlane.f32.xlu0 %v3414_v6  ;;  %v2841_v7 = vpop.f32.mrb[8].mxu0 }
 0x3f3   :  { %v2917_v14 = vpop.f32.mrb[14].mxu1  ;;  %v7335_v19 = vsel %vm3378_vm5, -1e+09, %v2841_v7  ;;  %v6015_v30 = vpop.f32.mrb[9].mxu0 }
 0x3f4   :  { %v7338_v29 = vsel %vm3378_vm5, -1e+09, %v2917_v14  ;;  %v6020_v37 = vpop.f32.mrb[15].mxu1  ;;  %v3420_v58 = vsel %vm3395_vm4, %v7335_v19, -inf }
 0x3f5   :  { %v3423_v42 = vsel %vm3395_vm4, %v7338_v29, -inf }
 0x3f6   :  { %3424 = vmax.xlane.f32.xlu1 %v3423_v42  ;;  %3421 = vmax.xlane.f32.xlu0 %v3420_v58 }
 0x3f8   :  { %v2993_v20 = vpop.f32.mrb[10].mxu0  ;;  %v3069_v62 = vpop.f32.mrb[16].mxu1 }
 0x3f9   :  { %v7345_v11 = vsel %vm3378_vm5, -1e+09, %v2993_v20  ;;  %v7348_v22 = vsel %vm3378_vm5, -1e+09, %v3069_v62  ;;  %v6025_v60 = vpop.f32.mrb[11].mxu0  ;;  %v6030_v41 = vpop.f32.mrb[17].mxu1 }
 0x3fa   :  { %v3429_v35 = vsel %vm3395_vm4, %v7348_v22, -inf  ;;  %v3426_v18 = vsel %vm3395_vm4, %v7345_v11, -inf }
 0x3fb   :  { %3430 = vmax.xlane.f32.xlu1 %v3429_v35  ;;  %3427 = vmax.xlane.f32.xlu0 %v3426_v18 }
 0x3fd   :  { %v3145_v13 = vpop.f32.mrb[12].mxu0  ;;  %v3221_v31 = vpop.f32.mrb[18].mxu1 }
 0x3fe   :  { %v7355_v53 = vsel %vm3378_vm5, -1e+09, %v3145_v13  ;;  %v6035_v26 = vpop.f32.mrb[13].mxu0  ;;  %v6040_v59 = vpop.f32.mrb[19].mxu1  ;;  %v7369_v47 = vsel %vm3378_vm5, -1e+09, %v3221_v31 }
 0x3ff   :  { %v3432_v0 = vsel %vm3395_vm4, %v7355_v53, -inf  ;;  %v3435_v21 = vsel %vm3395_vm4, %v7369_v47, -inf }
 0x400   :  { %3433 = vmax.xlane.f32.xlu0 %v3432_v0 }
 0x401   :  { %v3297_v27 = vpop.f32.mrb[14].mxu0 }
 0x402   :  { %v7360_v38 = vsel %vm3378_vm5, -1e+09, %v3297_v27  ;;  %v3373_v40 = vpop.f32.mrb[20].mxu1  ;;  %v6045_v23 = vpop.f32.mrb[15].mxu0 }
 0x403   :  { %v6050_v56 = vpop.f32.mrb[21].mxu1  ;;  %v3438_v36 = vsel %vm3395_vm4, %v7360_v38, -inf  ;;  %v7374_v39 = vsel %vm3378_vm5, -1e+09, %v3373_v40 }
 0x404   :  { %3439 = vmax.xlane.f32.xlu0 %v3438_v36  ;;  %v3441_v4 = vsel %vm3395_vm4, %v7374_v39, -inf }
 0x40c   :  { %1588 = vrot.lane.b32.xlu1 %v6671_v49, %s6453_s1 }
 0x41a   :  { %1582 = vrot.lane.b32.xlu0 %v6671_v49, %s6450_s2 }
 0x430   :  { %3436 = vmax.xlane.f32.xlu1 %v3435_v21 }
 0x434   :  { %3442 = vmax.xlane.f32.xlu1 %v3441_v4 }
 0x460   :  { %v3398_v17 = vpop.xlane.xlu0 %3397 }
 0x461   :  { %v3444_v55 = vsub.f32 %v7295_v28, %v3398_v17 }
 0x463   :  { %v3460_v50 = vmul.f32 1.442695, %v3444_v55 }
 0x465   :  { %6256 = vpow2.f32 %v3460_v50 }
 0x46c   :  { %v3401_v52 = vpop.xlane.xlu1 %3400 }
 0x46d   :  { %v3445_v5 = vsub.f32 %v7300_v9, %v3401_v52 }
 0x46e   :  { %v3404_v6 = vpop.xlane.xlu0 %3403 }
 0x46f   :  { %v7382_v7 = vpop.eup %6256  ;;  %v3462_v25 = vmul.f32 1.442695, %v3445_v5  ;;  %v3446_v14 = vsub.f32 %v7305_v15, %v3404_v6 }
 0x470   :  { %v3492_v30 = vsel %vm3395_vm4, %v7382_v7, 0.0 }
 0x471   :  { %6258 = vpow2.f32 %v3462_v25  ;;  %v3464_v37 = vmul.f32 1.442695, %v3446_v14  ;;  %3493 = vadd.xlane.f32.xlu0 %v3492_v30 }
 0x473   :  { %6260 = vpow2.f32 %v3464_v37 }
 0x477   :  { %v3410_v28 = vpop.xlane.xlu0 %3409  ;;  %v3413_v58 = vpop.xlane.xlu1 %3412 }
 0x478   :  { %v3448_v42 = vsub.f32 %v7310_v46, %v3410_v28  ;;  %v3449_v46 = vsub.f32 %v7313_v61, %v3413_v58 }
 0x47a   :  { %v3468_v20 = vmul.f32 1.442695, %v3448_v42  ;;  %v3470_v59 = vmul.f32 1.442695, %v3449_v46 }
 0x47b   :  { %v7388_v62 = vpop.eup %6258  ;;  %v3407_v9 = vpop.xlane.xlu0 %3406 }
 0x47c   :  { %v3447_v60 = vsub.f32 %v7320_v16, %v3407_v9  ;;  %v3495_v15 = vsel %vm3395_vm4, %v7388_v62, 0.0  ;;  %6262 = vpow2.f32 %v3468_v20 }
 0x47d   :  { %v7393_v41 = vpop.eup %6260  ;;  %3496 = vadd.xlane.f32.xlu1 %v3495_v15 }
 0x47e   :  { %v3466_v35 = vmul.f32 1.442695, %v3447_v60  ;;  %v3498_v18 = vsel %vm3395_vm4, %v7393_v41, 0.0  ;;  %v3419_v13 = vpop.xlane.xlu1 %3418 }
 0x47f   :  { %v3416_v31 = vpop.xlane.xlu0 %3415  ;;  %3499 = vadd.xlane.f32.xlu0 %v3498_v18  ;;  %v3451_v0 = vsub.f32 %v7328_v12, %v3419_v13 }
 0x480   :  { %6264 = vpow2.f32 %v3466_v35  ;;  %v3450_v26 = vsub.f32 %v7325_v48, %v3416_v31 }
 0x481   :  { %v3474_v61 = vmul.f32 1.442695, %v3451_v0 }
 0x482   :  { %v3472_v16 = vmul.f32 1.442695, %v3450_v26 }
 0x483   :  { %v3425_v27 = vpop.xlane.xlu1 %3424  ;;  %v3422_v40 = vpop.xlane.xlu0 %3421 }
 0x484   :  { %v3452_v23 = vsub.f32 %v7335_v19, %v3422_v40  ;;  %6266 = vpow2.f32 %v3472_v16  ;;  %v3453_v48 = vsub.f32 %v7338_v29, %v3425_v27 }
 0x485   :  { %6268 = vpow2.f32 %v3470_v59 }
 0x486   :  { %v3476_v56 = vmul.f32 1.442695, %v3452_v23  ;;  %v7401_v36 = vpop.eup %6262  ;;  %v3478_v5 = vmul.f32 1.442695, %v3453_v48 }
 0x487   :  { %v3504_v17 = vsel %vm3395_vm4, %v7401_v36, 0.0 }
 0x488   :  { %v3431_v21 = vpop.xlane.xlu1 %3430  ;;  %v3428_v4 = vpop.xlane.xlu0 %3427  ;;  %6270 = vpow2.f32 %v3476_v56  ;;  %3505 = vadd.xlane.f32.xlu1 %v3504_v17 }
 0x489   :  { %v3454_v12 = vsub.f32 %v7345_v11, %v3428_v4  ;;  %6272 = vpow2.f32 %v3474_v61  ;;  %v3455_v29 = vsub.f32 %v7348_v22, %v3431_v21 }
 0x48a   :  { %v7407_v55 = vpop.eup %6264 }
 0x48b   :  { %v3480_v19 = vmul.f32 1.442695, %v3454_v12  ;;  %v3501_v50 = vsel %vm3395_vm4, %v7407_v55, 0.0  ;;  %v3482_v20 = vmul.f32 1.442695, %v3455_v29 }
 0x48c   :  { %v1589_v52 = vpop.permute.xlu1 %1588  ;;  %3502 = vadd.xlane.f32.xlu1 %v3501_v50 }
 0x48d   :  { %v1768_v6 = vcombine.low %v7379_v34, %v1589_v52  ;;  %v1769_v25 = vcombine.high %v7379_v34, %v1589_v52  ;;  %v3434_v14 = vpop.xlane.xlu0 %3433  ;;  %6274 = vpow2.f32 %v3480_v19 }
 0x48e   :  { %v3456_v11 = vsub.f32 %v7355_v53, %v3434_v14  ;;  %v7415_v30 = vpop.eup %6266  ;;  %6276 = vpow2.f32 %v3478_v5 }
 0x48f   :  { %v3510_v28 = vsel %vm3395_vm4, %v7415_v30, 0.0  ;;  %v7419_v42 = vpop.eup %6268  ;;  %v1776_v46 = vrot.slane %v1768_v6, %v6759_v1  ;;  %v1783_v31 = vrot.slane %v1769_v25, %v6759_v1 }
 0x490   :  { %v3484_v37 = vmul.f32 1.442695, %v3456_v11  ;;  %3511 = vadd.xlane.f32.xlu0 %v3510_v28  ;;  %v3507_v53 = vsel %vm3395_vm4, %v7419_v42, 0.0 }
 0x491   :  { %v3440_v58 = vpop.xlane.xlu0 %3439 }
 0x492   :  { %6278 = vpow2.f32 %v3484_v37  ;;  %v7421_v34 = vpop.eup %6270  ;;  %v3458_v22 = vsub.f32 %v7360_v38, %v3440_v58 }
 0x493   :  { %v3516_v9 = vsel %vm3395_vm4, %v7421_v34, 0.0  ;;  %v7428_v60 = vpop.eup %6272  ;;  %6280 = vpow2.f32 %v3482_v20 }
 0x494   :  { %3508 = vadd.xlane.f32.xlu0 %v3507_v53  ;;  %3517 = vadd.xlane.f32.xlu1 %v3516_v9  ;;  %v3488_v13 = vmul.f32 1.442695, %v3458_v22  ;;  %v3513_v59 = vsel %vm3395_vm4, %v7428_v60, 0.0 }
 0x495   :  { %v1583_v15 = vpop.permute.xlu0 %1582 }
 0x496   :  { %v1752_v35 = vcombine.low %v6671_v49, %v1583_v15  ;;  %v1753_v18 = vcombine.high %v6671_v49, %v1583_v15  ;;  %6282 = vpow2.f32 %v3488_v13 }
 0x497   :  { %v7433_v38 = vpop.eup %6274 }
 0x498   :  { %v1760_v26 = vrot.slane %v1752_v35, %v6759_v1  ;;  %v1767_v16 = vrot.slane %v1753_v18, %v6759_v1  ;;  %3514 = vadd.xlane.f32.xlu0 %v3513_v59  ;;  %v7440_v56 = vpop.eup %6276  ;;  %v3522_v61 = vsel %vm3395_vm4, %v7433_v38, 0.0 }
 0x499   :  { %v3519_v25 = vsel %vm3395_vm4, %v7440_v56, 0.0 }
 0x49a   :  { %v1816_v0 = vcombine.low %v1760_v26, %v1776_v46  ;;  %v1817_v27 = vcombine.high %v1760_v26, %v1776_v46  ;;  %v1832_v40 = vcombine.low %v1767_v16, %v1783_v31  ;;  %v1833_v23 = vcombine.high %v1767_v16, %v1783_v31 }
 0x49c   :  { %v7444_v21 = vpop.eup %6278  ;;  %v1824_v4 = vrot.slane %v1816_v0, %v6763_v8  ;;  %v1831_v17 = vrot.slane %v1817_v27, %v6763_v8  ;;  %v1840_v48 = vrot.slane %v1832_v40, %v6763_v8  ;;  %v1847_v12 = vrot.slane %v1833_v23, %v6763_v8  ;;  %3523 = vadd.xlane.f32.xlu0 %v3522_v61 }
 0x49d   :  { %v3528_v19 = vsel %vm3395_vm4, %v7444_v21, 0.0  ;;  %v7454_v14 = vpop.eup %6280 }
 0x49e   :  { %v5752_v50 = vcombine.low %v1824_v4, %v1831_v17  ;;  %v5754_v52 = vcombine.high %v1824_v4, %v1831_v17  ;;  %v5756_v5 = vcombine.low %v1840_v48, %v1847_v12  ;;  %v5758_v6 = vcombine.high %v1840_v48, %v1847_v12  ;;  %3529 = vadd.xlane.f32.xlu1 %v3528_v19 }
 0x49f   :  { %v3525_v9 = vsel %vm3395_vm4, %v7454_v14, 0.0 }
 0x4a0   :  { %v2032_v29 = vrot.slane %v5752_v50, %v6759_v1  ;;  %v2048_v11 = vrot.slane %v5754_v52, %v6759_v1  ;;  %v2064_v37 = vrot.slane %v5756_v5, %v6759_v1  ;;  %v2080_v28 = vrot.slane %v5758_v6, %v6759_v1  ;;  %3520 = vadd.xlane.f32.xlu0 %v3519_v25  ;;  %v7474_v13 = vpop.eup %6282 }
 0x4a1   :  { %v3534_v0 = vsel %vm3395_vm4, %v7474_v13, 0.0 }
 0x4a2   :  { %v2088_v58 = vcombine.low %v2032_v29, %v2048_v11  ;;  %v2120_v20 = vcombine.low %v2064_v37, %v2080_v28  ;;  %v2089_v22 = vcombine.high %v2032_v29, %v2048_v11  ;;  %v2121_v53 = vcombine.high %v2064_v37, %v2080_v28 }
 0x4a4   :  { %v7463_v15 = vrot.slane %v2088_v58, %v6763_v8  ;;  %v7466_v35 = vrot.slane %v2120_v20, %v6763_v8  ;;  %v7469_v18 = vrot.slane %v2089_v22, %v6763_v8  ;;  %v7472_v46 = vrot.slane %v2121_v53, %v6763_v8  ;;  %3526 = vadd.xlane.f32.xlu0 %v3525_v9 }
 0x4a6   :  { %v2152_v31 = vcombine.low %v7463_v15, %v7466_v35  ;;  %v2154_v26 = vcombine.low %v7469_v18, %v7472_v46  ;;  %v2153_v16 = vcombine.high %v7463_v15, %v7466_v35  ;;  %v2155_v59 = vcombine.high %v7469_v18, %v7472_v46 }
 0x4a8   :  { %3535 = vadd.xlane.f32.xlu0 %v3534_v0 }
 0x4af   :  { %1600 = vrot.lane.b32.xlu1 %v6671_v49, %s6455_s23 }
 0x4b3   :  { %1606 = vrot.lane.b32.xlu1 %v6671_v49, %s6454_s30 }
 0x4bd   :  { %v3437_v27 = vpop.xlane.xlu1 %3436 }
 0x4be   :  { %v3457_v40 = vsub.f32 %v7369_v47, %v3437_v27 }
 0x4c0   :  { %v3486_v23 = vmul.f32 1.442695, %v3457_v40 }
 0x4c1   :  { %v3443_v61 = vpop.xlane.xlu1 %3442 }
 0x4c2   :  { %6284 = vpow2.f32 %v3486_v23  ;;  %v3459_v4 = vsub.f32 %v7374_v39, %v3443_v61 }
 0x4c4   :  { %v3490_v17 = vmul.f32 1.442695, %v3459_v4 }
 0x4c6   :  { %6286 = vpow2.f32 %v3490_v17 }
 0x4cc   :  { %v7492_v48 = vpop.eup %6284 }
 0x4cd   :  { %v3531_v12 = vsel %vm3395_vm4, %v7492_v48, 0.0 }
 0x4ce   :  { %3532 = vadd.xlane.f32.xlu0 %v3531_v12 }
 0x4d0   :  { %v7496_v19 = vpop.eup %6286 }
 0x4d1   :  { %v3537_v50 = vsel %vm3395_vm4, %v7496_v19, 0.0 }
 0x4d7   :  { %3538 = vadd.xlane.f32.xlu1 %v3537_v50 }
 0x4e4   :  { %1594 = vrot.lane.b32.xlu0 %v6671_v49, %s6452_s5 }
 0x4e8   :  { %1612 = vrot.lane.b32.xlu1 %v6671_v49, %s6456_s27 }
 0x4fe   :  { %v3494_v47 = vpop.xlane.xlu0 %3493 }
 0x4ff   :  { %6288 = vrcp.f32 %v3494_v47 }
 0x509   :  { %v6289_v39 = vpop.eup %6288 }
 0x50a   :  { %v3556_v52 = vmul.f32 %v6289_v39, %v7382_v7  ;;  %v3497_v5 = vpop.xlane.xlu1 %3496 }
 0x50b   :  { %6290 = vrcp.f32 %v3497_v5 }
 0x50c   :  { %v3500_v6 = vpop.xlane.xlu0 %3499  ;;  %6054 = vmatmul.mubr.msk.f32.vlgmr.msra.gmra.mrb[16].mxu0 %vm3395_vm4, %v3556_v52 }
 0x50d   :  { %6292 = vrcp.f32 %v3500_v6  ;;  %6062 = vmatpush3.msra.mxu0 %v2018_v32  ;;  %6063 = vmatprep.mubr.msk.f32.mxu0 %vm6458_vm1, %v6457_v54 }
 0x50e   :  { %6071 = vmatprep.subr.mxu0 %v6457_v54 }
 0x515   :  { %v6291_v49 = vpop.eup %6290  ;;  %v3506_v29 = vpop.xlane.xlu1 %3505 }
 0x516   :  { %v3557_v25 = vmul.f32 %v6291_v49, %v7388_v62  ;;  %6294 = vrcp.f32 %v3506_v29 }
 0x517   :  { %v6293_v7 = vpop.eup %6292 }
 0x518   :  { %v3558_v11 = vmul.f32 %v6293_v7, %v7393_v41  ;;  %6059 = vmatmul.mubr.msk.f32.vlgmr.msra.gmra.mrb[22].mxu1 %vm3395_vm4, %v3557_v25 }
 0x519   :  { %6067 = vmatpush3.msra.mxu1 %v2019_v33  ;;  %6068 = vmatprep.mubr.msk.f32.mxu1 %vm6458_vm1, %v6457_v54  ;;  %v3503_v32 = vpop.xlane.xlu1 %3502 }
 0x51a   :  { %6064 = vmatmul.mubr.msk.f32.vlgmr.msra.gmra.mrb[18].mxu0 %vm3395_vm4, %v3558_v11  ;;  %6076 = vmatprep.subr.mxu1 %v6457_v54  ;;  %6296 = vrcp.f32 %v3503_v32 }
 0x51b   :  { %6072 = vmatpush3.msra.mxu0 %v2020_v45  ;;  %6073 = vmatprep.mubr.msk.f32.mxu0 %vm6458_vm1, %v6457_v54 }
 0x51c   :  { %6081 = vmatprep.subr.mxu0 %v6457_v54 }
 0x51d   :  { %v3512_v57 = vpop.xlane.xlu0 %3511 }
 0x51e   :  { %6298 = vrcp.f32 %v3512_v57 }
 0x520   :  { %v6295_v63 = vpop.eup %6294 }
 0x521   :  { %v3560_v33 = vmul.f32 %v6295_v63, %v7401_v36  ;;  %v3518_v62 = vpop.xlane.xlu1 %3517  ;;  %v3509_v41 = vpop.xlane.xlu0 %3508 }
 0x522   :  { %6300 = vrcp.f32 %v3518_v62 }
 0x523   :  { %6302 = vrcp.f32 %v3509_v41  ;;  %6074 = vmatmul.mubr.msk.f32.vlgmr.msra.gmra.mrb[20].mxu0 %vm3395_vm4, %v3560_v33 }
 0x524   :  { %v6297_v37 = vpop.eup %6296  ;;  %6082 = vmatpush3.msra.mxu0 %v2022_v3  ;;  %6083 = vmatprep.mubr.msk.f32.mxu0 %vm6458_vm1, %v6457_v54 }
 0x525   :  { %v3559_v45 = vmul.f32 %v6297_v37, %v7407_v55  ;;  %v3515_v28 = vpop.xlane.xlu0 %3514  ;;  %6091 = vmatprep.subr.mxu0 %v6457_v54 }
 0x526   :  { %6304 = vrcp.f32 %v3515_v28 }
 0x527   :  { %6069 = vmatmul.mubr.msk.f32.vlgmr.msra.gmra.mrb[24].mxu1 %vm3395_vm4, %v3559_v45 }
 0x528   :  { %v6299_v36 = vpop.eup %6298  ;;  %6077 = vmatpush3.msra.mxu1 %v2021_v10  ;;  %6078 = vmatprep.mubr.msk.f32.mxu1 %vm6458_vm1, %v6457_v54 }
 0x529   :  { %v3562_v3 = vmul.f32 %v6299_v36, %v7415_v30  ;;  %v3524_v58 = vpop.xlane.xlu0 %3523  ;;  %6086 = vmatprep.subr.mxu1 %v6457_v54 }
 0x52a   :  { %6306 = vrcp.f32 %v3524_v58 }
 0x52b   :  { %6084 = vmatmul.mubr.msk.f32.vlgmr.msra.gmra.mrb[22].mxu0 %vm3395_vm4, %v3562_v3 }
 0x52c   :  { %v6301_v55 = vpop.eup %6300  ;;  %6092 = vmatpush3.msra.mxu0 %v2152_v31  ;;  %6093 = vmatprep.mubr.msk.f32.mxu0 %vm6458_vm1, %v6457_v54 }
 0x52d   :  { %v6303_v43 = vpop.eup %6302  ;;  %v3564_v51 = vmul.f32 %v6301_v55, %v7421_v34  ;;  %v3521_v10 = vpop.xlane.xlu0 %3520  ;;  %6101 = vmatprep.subr.mxu0 %v6457_v54 }
 0x52e   :  { %v3561_v30 = vmul.f32 %v6303_v43, %v7419_v42  ;;  %6308 = vrcp.f32 %v3521_v10 }
 0x52f   :  { %6094 = vmatmul.mubr.msk.f32.vlgmr.msra.gmra.mrb[24].mxu0 %vm3395_vm4, %v3564_v51 }
 0x530   :  { %v6305_v20 = vpop.eup %6304  ;;  %6079 = vmatmul.mubr.msk.f32.vlgmr.msra.gmra.mrb[26].mxu1 %vm3395_vm4, %v3561_v30  ;;  %6102 = vmatpush3.msra.mxu0 %v2154_v26 }
 0x531   :  { %v3563_v22 = vmul.f32 %v6305_v20, %v7428_v60  ;;  %6087 = vmatpush3.msra.mxu1 %v2023_v24  ;;  %v3527_v34 = vpop.xlane.xlu0 %3526  ;;  %6088 = vmatprep.mubr.msk.f32.mxu1 %vm6458_vm1, %v6457_v54 }
 0x532   :  { %6310 = vrcp.f32 %v3527_v34  ;;  %6096 = vmatprep.subr.mxu1 %v6457_v54  ;;  %6103 = vmatprep.mubr.msk.f32.mxu0 %vm6458_vm1, %v6457_v54 }
 0x533   :  { %6111 = vmatprep.subr.mxu0 %v6457_v54 }
 0x534   :  { %v6307_v42 = vpop.eup %6306  ;;  %6089 = vmatmul.mubr.msk.f32.vlgmr.msra.gmra.mrb[28].mxu1 %vm3395_vm4, %v3563_v22 }
 0x535   :  { %v3566_v60 = vmul.f32 %v6307_v42, %v7433_v38  ;;  %6097 = vmatpush3.msra.mxu1 %v2153_v16  ;;  %6098 = vmatprep.mubr.msk.f32.mxu1 %vm6458_vm1, %v6457_v54  ;;  %v3536_v9 = vpop.xlane.xlu0 %3535 }
 0x536   :  { %6106 = vmatprep.subr.mxu1 %v6457_v54 }
 0x537   :  { %6104 = vmatmul.mubr.msk.f32.vlgmr.msra.gmra.mrb[26].mxu0 %vm3395_vm4, %v3566_v60 }
 0x538   :  { %v6309_v44 = vpop.eup %6308  ;;  %6113 = vmatprep.mubr.msk.f32.mxu0 %vm6458_vm1, %v6457_v54 }
 0x539   :  { %v3565_v2 = vmul.f32 %v6309_v44, %v7440_v56  ;;  %v3530_v56 = vpop.xlane.xlu1 %3529 }
 0x53a   :  { %6312 = vrcp.f32 %v3530_v56 }
 0x53b   :  { %6099 = vmatmul.mubr.msk.f32.vlgmr.msra.gmra.mrb[30].mxu1 %vm3395_vm4, %v3565_v2 }
 0x53c   :  { %v6311_v24 = vpop.eup %6310  ;;  %6107 = vmatpush3.msra.mxu1 %v2155_v59  ;;  %6108 = vmatprep.mubr.msk.f32.mxu1 %vm6458_vm1, %v6457_v54 }
 0x53d   :  { %v3567_v38 = vmul.f32 %v6311_v24, %v7454_v14  ;;  %6116 = vmatprep.subr.mxu1 %v6457_v54  ;;  %v1601_v53 = vpop.permute.xlu1 %1600 }
 0x53f   :  { %6109 = vmatmul.mubr.msk.f32.vlgmr.msra.gmra.mrb[32].mxu1 %vm3395_vm4, %v3567_v38 }
 0x540   :  { %6118 = vmatprep.mubr.msk.f32.mxu1 %vm6458_vm1, %v6457_v54 }
 0x541   :  { %v1607_v35 = vpop.permute.xlu1 %1606 }
 0x544   :  { %v6313_v57 = vpop.eup %6312 }
 0x545   :  { %v3568_v10 = vmul.f32 %v6313_v57, %v7444_v21 }
 0x55b   :  { %v3533_v15 = vpop.xlane.xlu0 %3532 }
 0x55c   :  { %6314 = vrcp.f32 %v3533_v15 }
 0x55d   :  { %6316 = vrcp.f32 %v3536_v9 }
 0x55f   :  { %v1595_v31 = vpop.permute.xlu0 %1594 }
 0x560   :  { %v1784_v46 = vcombine.low %v1595_v31, %v1607_v35  ;;  %v1785_v26 = vcombine.high %v1595_v31, %v1607_v35 }
 0x562   :  { %v1792_v14 = vrot.slane %v1784_v46, %v6759_v1  ;;  %v1799_v27 = vrot.slane %v1785_v26, %v6759_v1 }
 0x564   :  { %v3539_v18 = vpop.xlane.xlu1 %3538 }
 0x565   :  { %6318 = vrcp.f32 %v3539_v18 }
 0x566   :  { %v6315_v37 = vpop.eup %6314 }
 0x567   :  { %v6317_v36 = vpop.eup %6316  ;;  %v3569_v30 = vmul.f32 %v6315_v37, %v7492_v48 }
 0x568   :  { %v1613_v16 = vpop.permute.xlu1 %1612  ;;  %v3570_v34 = vmul.f32 %v6317_v36, %v7474_v13 }
 0x569   :  { %v1800_v59 = vcombine.low %v1601_v53, %v1613_v16  ;;  %v1801_v0 = vcombine.high %v1601_v53, %v1613_v16 }
 0x56b   :  { %v1808_v40 = vrot.slane %v1800_v59, %v6759_v1  ;;  %v1815_v23 = vrot.slane %v1801_v0, %v6759_v1 }
 0x56d   :  { %v1848_v61 = vcombine.low %v1792_v14, %v1808_v40  ;;  %v1849_v4 = vcombine.high %v1792_v14, %v1808_v40  ;;  %v1864_v17 = vcombine.low %v1799_v27, %v1815_v23  ;;  %v1865_v12 = vcombine.high %v1799_v27, %v1815_v23 }
 0x56f   :  { %v1856_v50 = vrot.slane %v1848_v61, %v6763_v8  ;;  %v1863_v47 = vrot.slane %v1849_v4, %v6763_v8  ;;  %v1872_v39 = vrot.slane %v1864_v17, %v6763_v8  ;;  %v1879_v52 = vrot.slane %v1865_v12, %v6763_v8  ;;  %v6319_v51 = vpop.eup %6318 }
 0x570   :  { %v3571_v42 = vmul.f32 %v6319_v51, %v7496_v19 }
 0x571   :  { %v5753_v5 = vcombine.low %v1856_v50, %v1863_v47  ;;  %v5755_v6 = vcombine.high %v1856_v50, %v1863_v47  ;;  %v5757_v49 = vcombine.low %v1872_v39, %v1879_v52  ;;  %v5759_v25 = vcombine.high %v1872_v39, %v1879_v52 }
 0x573   :  { %v2039_v29 = vrot.slane %v5753_v5, %v6759_v1  ;;  %v2055_v7 = vrot.slane %v5755_v6, %v6759_v1  ;;  %v2071_v11 = vrot.slane %v5757_v49, %v6759_v1  ;;  %v2087_v32 = vrot.slane %v5759_v25, %v6759_v1 }
 0x575   :  { %v2104_v63 = vcombine.low %v2039_v29, %v2055_v7  ;;  %v2136_v33 = vcombine.low %v2071_v11, %v2087_v32  ;;  %v2105_v62 = vcombine.high %v2039_v29, %v2055_v7  ;;  %v2137_v41 = vcombine.high %v2071_v11, %v2087_v32 }
 0x577   :  { %v2112_v45 = vrot.slane %v2104_v63, %v6763_v8  ;;  %v2144_v28 = vrot.slane %v2136_v33, %v6763_v8  ;;  %v2119_v3 = vrot.slane %v2105_v62, %v6763_v8  ;;  %v2151_v58 = vrot.slane %v2137_v41, %v6763_v8 }
 0x579   :  { %v2156_v55 = vcombine.low %v2112_v45, %v2144_v28  ;;  %v2157_v43 = vcombine.high %v2112_v45, %v2144_v28  ;;  %v2158_v20 = vcombine.low %v2119_v3, %v2151_v58  ;;  %v2159_v22 = vcombine.high %v2119_v3, %v2151_v58 }
 0x57b   :  { %6112 = vmatpush3.msra.mxu0 %v2156_v55  ;;  %6117 = vmatpush3.msra.mxu1 %v2157_v43 }
 0x57c   :  { %6114 = vmatmul.mubr.msk.f32.vlgmr.msra.gmra.mrb[28].mxu0 %vm3395_vm4, %v3568_v10  ;;  %6119 = vmatmul.mubr.msk.f32.vlgmr.msra.gmra.mrb[34].mxu1 %vm3395_vm4, %v3569_v30 }
 0x57d   :  { %6121 = vmatprep.subr.mxu0 %v6457_v54  ;;  %6126 = vmatprep.subr.mxu1 %v6457_v54 }
 0x57e   :  { %6122 = vmatpush3.msra.mxu0 %v2158_v20  ;;  %6127 = vmatpush3.msra.mxu1 %v2159_v22 }
 0x57f   :  { %6123 = vmatprep.mubr.msk.f32.mxu0 %vm6458_vm1, %v6457_v54  ;;  %6128 = vmatprep.mubr.msk.f32.mxu1 %vm6458_vm1, %v6457_v54 }
 0x580   :  { %6124 = vmatmul.mubr.msk.f32.vlgmr.msra.gmra.mrb[30].mxu0 %vm3395_vm4, %v3570_v34  ;;  %6129 = vmatmul.mubr.msk.f32.vlgmr.msra.gmra.mrb[36].mxu1 %vm3395_vm4, %v3571_v42 }
 0x5df   :  { %v3641_v21 = vpop.f32.mrb[16].mxu0 }
 0x5e0   :  { %v6055_v48 = vpop.f32.mrb[17].mxu0 }
 0x5eb   :  { %v3714_v60 = vpop.f32.mrb[22].mxu1 }
 0x5ec   :  { %v6060_v44 = vpop.f32.mrb[23].mxu1 }
 0x5ed   :  { %v3787_v2 = vpop.f32.mrb[18].mxu0 }
 0x5ee   :  { %v4740_v13 = vcombine.low %v3641_v21, %v3787_v2  ;;  %v4741_v24 = vcombine.high %v3641_v21, %v3787_v2  ;;  %v6065_v19 = vpop.f32.mrb[19].mxu0 }
 0x5f0   :  { %v4748_v54 = vrot.slane %v4740_v13, %v6759_v1  ;;  %v4755_v31 = vrot.slane %v4741_v24, %v6759_v1 }
 0x5f6   :  { %v3933_v38 = vpop.f32.mrb[20].mxu0 }
 0x5f7   :  { %v6075_v56 = vpop.f32.mrb[21].mxu0 }
 0x5fa   :  { %v3860_v53 = vpop.f32.mrb[24].mxu1 }
 0x5fb   :  { %v4756_v9 = vcombine.low %v3714_v60, %v3860_v53  ;;  %v4757_v15 = vcombine.high %v3714_v60, %v3860_v53  ;;  %v6070_v35 = vpop.f32.mrb[25].mxu1 }
 0x5fd   :  { %v4764_v18 = vrot.slane %v4756_v9, %v6759_v1  ;;  %v4771_v46 = vrot.slane %v4757_v15, %v6759_v1 }
 0x5fe   :  { %v4079_v26 = vpop.f32.mrb[22].mxu0 }
 0x5ff   :  { %v4804_v16 = vcombine.low %v4748_v54, %v4764_v18  ;;  %v4805_v59 = vcombine.high %v4748_v54, %v4764_v18  ;;  %v4820_v0 = vcombine.low %v4755_v31, %v4771_v46  ;;  %v4821_v14 = vcombine.high %v4755_v31, %v4771_v46  ;;  %v6085_v27 = vpop.f32.mrb[23].mxu0 }
 0x600   :  { %v4772_v40 = vcombine.low %v3933_v38, %v4079_v26  ;;  %v4773_v23 = vcombine.high %v3933_v38, %v4079_v26 }
 0x601   :  { %v4812_v61 = vrot.slane %v4804_v16, %v6763_v8  ;;  %v4819_v4 = vrot.slane %v4805_v59, %v6763_v8  ;;  %v4828_v17 = vrot.slane %v4820_v0, %v6763_v8  ;;  %v4835_v12 = vrot.slane %v4821_v14, %v6763_v8 }
 0x602   :  { %v7630_v50 = vpop.f32.mrb[24].mxu0  ;;  %v4780_v43 = vrot.slane %v4772_v40, %v6759_v1  ;;  %v4787_v51 = vrot.slane %v4773_v23, %v6759_v1 }
 0x603   :  { %v5808_v47 = vcombine.low %v4812_v61, %v4819_v4  ;;  %v5810_v39 = vcombine.high %v4812_v61, %v4819_v4  ;;  %v5812_v52 = vcombine.low %v4828_v17, %v4835_v12  ;;  %v5814_v5 = vcombine.high %v4828_v17, %v4835_v12  ;;  %v4006_v6 = vpop.f32.mrb[26].mxu1  ;;  %v6095_v49 = vpop.f32.mrb[25].mxu0 }
 0x604   :  { %v6080_v25 = vpop.f32.mrb[27].mxu1 }
 0x605   :  { %v5020_v29 = vrot.slane %v5808_v47, %v6759_v1  ;;  %v5036_v7 = vrot.slane %v5810_v39, %v6759_v1  ;;  %v5052_v11 = vrot.slane %v5812_v52, %v6759_v1  ;;  %v5068_v32 = vrot.slane %v5814_v5, %v6759_v1 }
 0x607   :  { %v4152_v57 = vpop.f32.mrb[28].mxu1  ;;  %v5076_v63 = vcombine.low %v5020_v29, %v5036_v7  ;;  %v5108_v33 = vcombine.low %v5052_v11, %v5068_v32  ;;  %v5077_v62 = vcombine.high %v5020_v29, %v5036_v7  ;;  %v5109_v41 = vcombine.high %v5052_v11, %v5068_v32 }
 0x608   :  { %v4788_v37 = vcombine.low %v4006_v6, %v4152_v57  ;;  %v4789_v45 = vcombine.high %v4006_v6, %v4152_v57  ;;  %v6090_v28 = vpop.f32.mrb[29].mxu1 }
 0x609   :  { %v7637_v36 = vrot.slane %v5076_v63, %v6763_v8  ;;  %v7640_v3 = vrot.slane %v5108_v33, %v6763_v8  ;;  %v5091_v58 = vrot.slane %v5077_v62, %v6763_v8  ;;  %v5123_v55 = vrot.slane %v5109_v41, %v6763_v8 }
 0x60a   :  { %v4796_v10 = vrot.slane %v4788_v37, %v6759_v1  ;;  %v4803_v30 = vrot.slane %v4789_v45, %v6759_v1  ;;  %v4371_v20 = vpop.f32.mrb[26].mxu0 }
 0x60b   :  { %v4876_v22 = vcombine.low %v7630_v50, %v4371_v20  ;;  %v4877_v34 = vcombine.high %v7630_v50, %v4371_v20  ;;  %v6105_v42 = vpop.f32.mrb[27].mxu0  ;;  %v5141_v21 = vcombine.high %v7637_v36, %v7640_v3  ;;  %v5142_v48 = vcombine.low %v5091_v58, %v5123_v55 }
 0x60c   :  { %v4836_v60 = vcombine.low %v4780_v43, %v4796_v10  ;;  %v4837_v44 = vcombine.high %v4780_v43, %v4796_v10  ;;  %v4852_v2 = vcombine.low %v4787_v51, %v4803_v30  ;;  %v4853_v13 = vcombine.high %v4787_v51, %v4803_v30 }
 0x60d   :  { %5286 = vrot.lane.b32.xlu0 %v5141_v21, %s6461_s29  ;;  %v5143_v24 = vcombine.high %v5091_v58, %v5123_v55  ;;  %v5140_v19 = vcombine.low %v7637_v36, %v7640_v3  ;;  %v4884_v50 = vrot.slane %v4876_v22, %v6759_v1  ;;  %v4891_v47 = vrot.slane %v4877_v34, %v6759_v1 }
 0x60e   :  { %v4844_v38 = vrot.slane %v4836_v60, %v6763_v8  ;;  %v4851_v56 = vrot.slane %v4837_v44, %v6763_v8  ;;  %v4860_v53 = vrot.slane %v4852_v2, %v6763_v8  ;;  %v4867_v9 = vrot.slane %v4853_v13, %v6763_v8  ;;  %v4298_v15 = vpop.f32.mrb[30].mxu1 }
 0x60f   :  { %v6100_v35 = vpop.f32.mrb[31].mxu1 }
 0x610   :  { %v5809_v54 = vcombine.low %v4844_v38, %v4851_v56  ;;  %v5811_v31 = vcombine.high %v4844_v38, %v4851_v56  ;;  %v5813_v18 = vcombine.low %v4860_v53, %v4867_v9  ;;  %v5815_v46 = vcombine.high %v4860_v53, %v4867_v9 }
 0x611   :  { %5294 = vrot.lane.b32.xlu0 %v5142_v48, %s6447_s26 }
 0x612   :  { %v4444_v26 = vpop.f32.mrb[32].mxu1  ;;  %v5027_v16 = vrot.slane %v5809_v54, %v6759_v1  ;;  %v5043_v59 = vrot.slane %v5811_v31, %v6759_v1  ;;  %v5059_v0 = vrot.slane %v5813_v18, %v6759_v1  ;;  %v5075_v14 = vrot.slane %v5815_v46, %v6759_v1 }
 0x613   :  { %v4892_v27 = vcombine.low %v4298_v15, %v4444_v26  ;;  %v4893_v40 = vcombine.high %v4298_v15, %v4444_v26  ;;  %v6110_v23 = vpop.f32.mrb[33].mxu1 }
 0x614   :  { %v5092_v61 = vcombine.low %v5027_v16, %v5043_v59  ;;  %v5124_v4 = vcombine.low %v5059_v0, %v5075_v14  ;;  %v5093_v17 = vcombine.high %v5027_v16, %v5043_v59  ;;  %v5125_v12 = vcombine.high %v5059_v0, %v5075_v14 }
 0x615   :  { %v4900_v39 = vrot.slane %v4892_v27, %v6759_v1  ;;  %v4907_v52 = vrot.slane %v4893_v40, %v6759_v1  ;;  %5302 = vrot.lane.b32.xlu0 %v5143_v24, %s6462_s15 }
 0x616   :  { %v5100_v5 = vrot.slane %v5092_v61, %v6763_v8  ;;  %v5132_v6 = vrot.slane %v5124_v4, %v6763_v8  ;;  %v5107_v49 = vrot.slane %v5093_v17, %v6763_v8  ;;  %v5139_v25 = vrot.slane %v5125_v12, %v6763_v8 }
 0x617   :  { %v4940_v29 = vcombine.low %v4884_v50, %v4900_v39  ;;  %v4941_v7 = vcombine.high %v4884_v50, %v4900_v39  ;;  %v4956_v11 = vcombine.low %v4891_v47, %v4907_v52  ;;  %v4957_v32 = vcombine.high %v4891_v47, %v4907_v52 }
 0x618   :  { %v5144_v57 = vcombine.low %v5100_v5, %v5132_v6  ;;  %v5145_v63 = vcombine.high %v5100_v5, %v5132_v6  ;;  %v5146_v33 = vcombine.low %v5107_v49, %v5139_v25  ;;  %v5147_v62 = vcombine.high %v5107_v49, %v5139_v25 }
 0x619   :  { %v4948_v41 = vrot.slane %v4940_v29, %v6763_v8  ;;  %v4955_v37 = vrot.slane %v4941_v7, %v6763_v8  ;;  %v4964_v45 = vrot.slane %v4956_v11, %v6763_v8  ;;  %v4971_v28 = vrot.slane %v4957_v32, %v6763_v8  ;;  %v5359_v7 = vld [vmem:[#allocation7] sm:$0xff]  ;;  %v5360_v11 = vld [vmem:[#allocation7 + $0x8] sm:$0xff] }
 0x61a   :  { %5310 = vrot.lane.b32.xlu0 %v5144_v57, %s6463_s17 }
 0x61b   :  { %v5816_v58 = vcombine.low %v4948_v41, %v4955_v37  ;;  %v5818_v55 = vcombine.high %v4948_v41, %v4955_v37  ;;  %v5820_v43 = vcombine.low %v4964_v45, %v4971_v28  ;;  %v5822_v51 = vcombine.high %v4964_v45, %v4971_v28 }
 0x61d   :  { %v5156_v10 = vrot.slane %v5816_v58, %v6759_v1  ;;  %v5172_v30 = vrot.slane %v5818_v55, %v6759_v1  ;;  %v5188_v20 = vrot.slane %v5820_v43, %v6759_v1  ;;  %v5204_v22 = vrot.slane %v5822_v51, %v6759_v1  ;;  %v5361_v58 = vld [vmem:[#allocation7 + $0x10] sm:$0xff]  ;;  %v5362_v55 = vld [vmem:[#allocation7 + $0x18] sm:$0xff] }
 0x61e   :  { %5318 = vrot.lane.b32.xlu0 %v5145_v63, %s6464_s18 }
 0x61f   :  { %v5212_v34 = vcombine.low %v5156_v10, %v5172_v30  ;;  %v5244_v42 = vcombine.low %v5188_v20, %v5204_v22  ;;  %v5213_v21 = vcombine.high %v5156_v10, %v5172_v30  ;;  %v5245_v48 = vcombine.high %v5188_v20, %v5204_v22 }
 0x620   :  { %v6200_v20 = vpack.c.bf16 %v5362_v55, %v5361_v58  ;;  %v5585_v58 = vld [vmem:[%s7823_s12 + $0x8] sm:$0xff]  ;;  %v5586_v55 = vld [vmem:[%s7823_s12 + $0x10] sm:$0xff] }
 0x621   :  { %v7684_v60 = vrot.slane %v5212_v34, %v6763_v8  ;;  %v7687_v44 = vrot.slane %v5244_v42, %v6763_v8  ;;  %v5227_v2 = vrot.slane %v5213_v21, %v6763_v8  ;;  %v5259_v13 = vrot.slane %v5245_v48, %v6763_v8 }
 0x622   :  { %5326 = vrot.lane.b32.xlu0 %v5146_v33, %s6465_s7 }
 0x623   :  { %v5277_v24 = vcombine.high %v7684_v60, %v7687_v44  ;;  %v5278_v38 = vcombine.low %v5227_v2, %v5259_v13  ;;  %v5279_v56 = vcombine.high %v5227_v2, %v5259_v13  ;;  %v5276_v53 = vcombine.low %v7684_v60, %v7687_v44  ;;  %v6324_v44 = vld [vmem:[#allocation2 + $0x8] sm:$0xff] }
 0x625   :  { %5288 = vrot.lane.b32.xlu1 %v5277_v24, %s6461_s29 }
 0x626   :  { %5334 = vrot.lane.b32.xlu0 %v5147_v62, %s6466_s4  ;;  %v6196_v62 = vpack.c.bf16 %v5360_v11, %v5359_v7 }
 0x628   :  { %6197 = vmatprep.subr.bf16.mxu0 %v6196_v62 }
 0x629   :  { %5296 = vrot.lane.b32.xlu1 %v5278_v38, %s6447_s26  ;;  %6199 = vmatpush3.bf16.msra.mxu0 %v6196_v62  ;;  %v5492_v62 = vld [vmem:[#allocation8 + $0x10] sm:$0xff] }
 0x62a   :  { %6201 = vmatprep.subr.bf16.mxu0 %v6200_v20 }
 0x62d   :  { %5304 = vrot.lane.b32.xlu1 %v5279_v56, %s6462_s15  ;;  %6203 = vmatpush3.bf16.msra.mxu0 %v6200_v20  ;;  %v5589_v20 = vld [vmem:[%s7823_s12 + $0x28] sm:$0xff] }
 0x64f   :  { %v4517_v9 = vpop.f32.mrb[28].mxu0  ;;  %v4590_v15 = vpop.f32.mrb[34].mxu1 }
 0x650   :  { %v6115_v35 = vpop.f32.mrb[29].mxu0  ;;  %v6120_v54 = vpop.f32.mrb[35].mxu1 }
 0x653   :  { %v4663_v31 = vpop.f32.mrb[30].mxu0  ;;  %v4736_v18 = vpop.f32.mrb[36].mxu1 }
 0x654   :  { %v4908_v46 = vcombine.low %v4517_v9, %v4663_v31  ;;  %v4909_v26 = vcombine.high %v4517_v9, %v4663_v31  ;;  %v4924_v16 = vcombine.low %v4590_v15, %v4736_v18  ;;  %v4925_v59 = vcombine.high %v4590_v15, %v4736_v18  ;;  %v6125_v0 = vpop.f32.mrb[31].mxu0  ;;  %v6130_v14 = vpop.f32.mrb[37].mxu1 }
 0x656   :  { %v4916_v27 = vrot.slane %v4908_v46, %v6759_v1  ;;  %v4923_v40 = vrot.slane %v4909_v26, %v6759_v1  ;;  %v4932_v23 = vrot.slane %v4924_v16, %v6759_v1  ;;  %v4939_v61 = vrot.slane %v4925_v59, %v6759_v1 }
 0x658   :  { %v4972_v4 = vcombine.low %v4916_v27, %v4932_v23  ;;  %v4973_v17 = vcombine.high %v4916_v27, %v4932_v23  ;;  %v4988_v12 = vcombine.low %v4923_v40, %v4939_v61  ;;  %v4989_v50 = vcombine.high %v4923_v40, %v4939_v61 }
 0x65a   :  { %v4980_v47 = vrot.slane %v4972_v4, %v6763_v8  ;;  %v4987_v39 = vrot.slane %v4973_v17, %v6763_v8  ;;  %v4996_v52 = vrot.slane %v4988_v12, %v6763_v8  ;;  %v5003_v5 = vrot.slane %v4989_v50, %v6763_v8  ;;  %v6325_v12 = vld [vmem:[#allocation2] sm:$0xff] }
 0x65c   :  { %v5817_v6 = vcombine.low %v4980_v47, %v4987_v39  ;;  %v5819_v49 = vcombine.high %v4980_v47, %v4987_v39  ;;  %v5821_v25 = vcombine.low %v4996_v52, %v5003_v5  ;;  %v5823_v29 = vcombine.high %v4996_v52, %v5003_v5 }
 0x65e   :  { %v5163_v32 = vrot.slane %v5817_v6, %v6759_v1  ;;  %v5179_v57 = vrot.slane %v5819_v49, %v6759_v1  ;;  %v5195_v63 = vrot.slane %v5821_v25, %v6759_v1  ;;  %v5211_v33 = vrot.slane %v5823_v29, %v6759_v1 }
 0x660   :  { %v5228_v41 = vcombine.low %v5163_v32, %v5179_v57  ;;  %v5260_v37 = vcombine.low %v5195_v63, %v5211_v33  ;;  %v5229_v45 = vcombine.high %v5163_v32, %v5179_v57  ;;  %v5261_v28 = vcombine.high %v5195_v63, %v5211_v33  ;;  %v5490_v63 = vld [vmem:[#allocation8] sm:$0xff]  ;;  %v5491_v33 = vld [vmem:[#allocation8 + $0x8] sm:$0xff] }
 0x662   :  { %v5236_v43 = vrot.slane %v5228_v41, %v6763_v8  ;;  %v5268_v51 = vrot.slane %v5260_v37, %v6763_v8  ;;  %v5243_v10 = vrot.slane %v5229_v45, %v6763_v8  ;;  %v5275_v30 = vrot.slane %v5261_v28, %v6763_v8  ;;  %v5493_v37 = vld [vmem:[#allocation8 + $0x18] sm:$0xff]  ;;  %v5584_v28 = vld [vmem:[%s7823_s12] sm:$0xff] }
 0x663   :  { %v6204_v41 = vpack.c.bf16 %v5491_v33, %v5490_v63  ;;  %v6208_v45 = vpack.c.bf16 %v5493_v37, %v5492_v62 }
 0x664   :  { %v5280_v22 = vcombine.low %v5236_v43, %v5268_v51  ;;  %v5281_v1 = vcombine.high %v5236_v43, %v5268_v51  ;;  %v5282_v34 = vcombine.low %v5243_v10, %v5275_v30  ;;  %v5283_v42 = vcombine.high %v5243_v10, %v5275_v30  ;;  %v5587_v51 = vld [vmem:[%s7823_s12 + $0x18] sm:$0xff]  ;;  %v5588_v30 = vld [vmem:[%s7823_s12 + $0x20] sm:$0xff] }
 0x665   :  { %6205 = vmatprep.subr.bf16.mxu1 %v6204_v41  ;;  %v6212_v43 = vpack.c.bf16 %v5585_v58, %v5584_v28  ;;  %v6216_v10 = vpack.c.bf16 %v5587_v51, %v5586_v55 }
 0x666   :  { %5312 = vrot.lane.b32.xlu1 %v5280_v22, %s6463_s17  ;;  %6207 = vmatpush3.bf16.msra.mxu1 %v6204_v41  ;;  %v6220_v22 = vpack.c.bf16 %v5589_v20, %v5588_v30 }
 0x667   :  { %6209 = vmatprep.subr.bf16.mxu1 %v6208_v45  ;;  %6213 = vmatprep.subr.bf16.mxu0 %v6212_v43 }
 0x66a   :  { %5320 = vrot.lane.b32.xlu1 %v5281_v1, %s6464_s18  ;;  %6211 = vmatpush3.bf16.msra.mxu1 %v6208_v45 }
 0x66e   :  { %5328 = vrot.lane.b32.xlu1 %v5282_v34, %s6465_s7 }
 0x672   :  { %5336 = vrot.lane.b32.xlu1 %v5283_v42, %s6466_s4 }
 0x67f   :  { %v5287_v21 = vpop.permute.xlu0 %5286 }
 0x680   :  { %v5340_v24 = vsel %vm2160_vm2, %v5140_v19, %v5287_v21 }
 0x683   :  { %v5295_v48 = vpop.permute.xlu0 %5294 }
 0x684   :  { %v5342_v38 = vsel %vm3395_vm4, %v5340_v24, %v5295_v48 }
 0x687   :  { %v5303_v2 = vpop.permute.xlu0 %5302 }
 0x688   :  { %v5345_v9 = vsel %vm5344_vm6, %v5342_v38, %v5303_v2  ;;  %v5827_v38 = vld [vmem:[%s7820_s9] ss:$0 sm:$0xff] }
 0x68c   :  { %v5311_v8 = vpop.permute.xlu0 %5310 }
 0x68d   :  { %v5348_v15 = vsel %vm5347_vm7, %v5345_v9, %v5311_v8 }
 0x690   :  { %v5319_v13 = vpop.permute.xlu0 %5318 }
 0x691   :  { %v5351_v35 = vsel %vm5350_vm8, %v5348_v15, %v5319_v13  ;;  %v5826_v13 = vld [vmem:[%s7819_s8] ss:$0 sm:$0xff] }
 0x694   :  { %v5327_v56 = vpop.permute.xlu0 %5326 }
 0x695   :  { %v5354_v31 = vsel %vm5353_vm9, %v5351_v35, %v5327_v56 }
 0x697   :  { %v5289_v54 = vpop.permute.xlu1 %5288 }
 0x698   :  { %v5335_v18 = vpop.permute.xlu0 %5334  ;;  %v5341_v19 = vsel %vm2160_vm2, %v5276_v53, %v5289_v54 }
 0x699   :  { %v5357_v36 = vsel %vm5356_vm10, %v5354_v31, %v5335_v18  ;;  %v5590_v18 = vld [vmem:[%s7823_s12 + $0x30] sm:$0xff] }
 0x69a   :  { %6139 = vmatprep.mubr.msk.f32.mxu0 %vm109_vm0, %v5357_v36  ;;  %v5591_v36 = vld [vmem:[%s7823_s12 + $0x38] sm:$0xff]  ;;  %s6467_s12 = smov [#allocation10]  }
 0x69b   :  { %v5297_v3 = vpop.permute.xlu1 %5296  ;;  %s5690_s4 = sshll.u32 %s6467_s12, 4  ;;  %s5691_s4 = int_to_ptr.vmem [resolvable:$true] %s5690_s4 }
 0x69c   :  { %v5343_v46 = vsel %vm3395_vm4, %v5341_v19, %v5297_v3  ;;  %v6224_v3 = vpack.c.bf16 %v5591_v36, %v5590_v18  ;;  %v5828_v19 = vld [vmem:[%s7822_s11] ss:$0 sm:$0xff]  ;;  %s6414_s11 = scalar_lea.vmem %s5691_s4, 256  ;;  %p6419_p5 = scmp.lt.s32.totalorder %s5691_s4, %s5691_s4 }
 0x69d   :  { %p6415_p4 = scmp.ne.s32.totalorder %s5691_s4, %s6414_s11  ;;  %p6420_p6 = scmp.lt.s32.totalorder %s6414_s11, %s6414_s11 }
 0x69f   :  { %v5305_v26 = vpop.permute.xlu1 %5304  ;;  %p6421_p7 = por %p6420_p6, %p6419_p5 }
 0x6a0   :  { %v5346_v16 = vsel %vm5344_vm6, %v5343_v46, %v5305_v26 }
 0x6a1   :  { %p6422_p8 = pnand %p6421_p7, %p6415_p4 }
 0x6d8   :  { %v5313_v59 = vpop.permute.xlu1 %5312 }
 0x6d9   :  { %v5349_v27 = vsel %vm5347_vm7, %v5346_v16, %v5313_v59 }
 0x6dc   :  { %v5321_v0 = vpop.permute.xlu1 %5320 }
 0x6dd   :  { %v5352_v40 = vsel %vm5350_vm8, %v5349_v27, %v5321_v0  ;;  %v5831_v27 = vld [vmem:[%s7824_s13] ss:$0 sm:$0xff] }
 0x6e0   :  { %v5329_v14 = vpop.permute.xlu1 %5328 }
 0x6e1   :  { %v5355_v23 = vsel %vm5353_vm9, %v5352_v40, %v5329_v14 }
 0x6e4   :  { %v5337_v61 = vpop.permute.xlu1 %5336 }
 0x6e5   :  { %v5358_v4 = vsel %vm5356_vm10, %v5355_v23, %v5337_v61 }
 0x6e6   :  { %6140 = vmatmul.mubr.msk.f32.vlgmr.msra.gmra.mrb[32].mxu0 %vm109_vm0, %v5358_v4 }
 0x6e7   :  { %6215 = vmatpush3.bf16.msra.mxu0 %v6212_v43 }
 0x6e8   :  { %6217 = vmatprep.subr.bf16.mxu0 %v6216_v10 }
 0x6eb   :  { %6219 = vmatpush3.bf16.msra.mxu0 %v6216_v10 }
 0x6ec   :  { %6221 = vmatprep.subr.bf16.mxu0 %v6220_v22 }
 0x6ef   :  { %6223 = vmatpush3.bf16.msra.mxu0 %v6220_v22 }
 0x6f0   :  { %6225 = vmatprep.subr.bf16.mxu0 %v6224_v3 }
 0x6f3   :  { %6227 = vmatpush3.bf16.msra.mxu0 %v6224_v3 }
 0x7b9   :  { %v6141_v60 = vpop.f32.mrb[32].mxu0 }
 0x7ba   :  { %v7742_v53 = vadd.f32 %v6324_v44, %v6141_v60  ;;  %v5435_v17 = vpop.f32.mrb[33].mxu0 }
 0x7bb   :  { %v7744_v50 = vadd.f32 %v6325_v12, %v5435_v17 }
 0x7bc   :  { %v5451_v47 = vsel %vm109_vm0, %v7742_v53, 0.0 }
 0x7bd   :  { %5452 = vadd.xlane.f32.xlu1 %v5451_v47  ;;  %v5448_v39 = vsel %vm109_vm0, %v7744_v50, 0.0 }
 0x7be   :  { %5449 = vadd.xlane.f32.xlu0 %v5448_v39 }
 0x84a   :  { %v5453_v52 = vpop.xlane.xlu1 %5452 }
 0x84b   :  { %v5455_v5 = vmul.f32 0.03125, %v5453_v52  ;;  %v5450_v6 = vpop.xlane.xlu0 %5449 }
 0x84c   :  { %v5454_v49 = vmul.f32 0.03125, %v5450_v6 }
 0x84d   :  { %v5457_v25 = vsub.f32 %v7742_v53, %v5455_v5 }
 0x84e   :  { %v5456_v29 = vsub.f32 %v7744_v50, %v5454_v49 }
 0x84f   :  { %v5459_v32 = vmul.f32 %v5457_v25, %v5457_v25 }
 0x850   :  { %v5458_v7 = vmul.f32 %v5456_v29, %v5456_v29 }
 0x851   :  { %v5463_v57 = vsel %vm109_vm0, %v5459_v32, 0.0 }
 0x852   :  { %v5460_v11 = vsel %vm109_vm0, %v5458_v7, 0.0 }
 0x853   :  { %5461 = vadd.xlane.f32.xlu0 %v5460_v11 }
 0x857   :  { %5464 = vadd.xlane.f32.xlu0 %v5463_v57 }
 0x8e0   :  { %v5462_v1 = vpop.xlane.xlu0 %5461 }
 0x8e1   :  { %v5466_v34 = vmul.f32 0.03125, %v5462_v1 }
 0x8e3   :  { %v5468_v42 = vadd.f32 1e-06, %v5466_v34 }
 0x8e4   :  { %v5465_v21 = vpop.xlane.xlu0 %5464 }
 0x8e5   :  { %6320 = vrsqrt.f32 %v5468_v42  ;;  %v5467_v48 = vmul.f32 0.03125, %v5465_v21 }
 0x8e7   :  { %v5469_v2 = vadd.f32 1e-06, %v5467_v48 }
 0x8e9   :  { %6322 = vrsqrt.f32 %v5469_v2 }
 0x8ef   :  { %v6321_v8 = vpop.eup %6320 }
 0x8f0   :  { %v5472_v24 = vmul.f32 %v6321_v8, %v5456_v29 }
 0x8f2   :  { %v5480_v56 = vmul.f32 %v5826_v13, %v5472_v24 }
 0x8f3   :  { %v6323_v9 = vpop.eup %6322 }
 0x8f4   :  { %v5473_v15 = vmul.f32 %v6323_v9, %v5457_v25  ;;  %v5488_v35 = vadd.f32 %v5827_v38, %v5480_v56 }
 0x8f6   :  { %v5481_v54 = vmul.f32 %v5826_v13, %v5473_v15  ;;  %6150 = vmatprep.mubr.msk.f32.mxu1 %vm109_vm0, %v5488_v35 }
 0x8f8   :  { %v5489_v31 = vadd.f32 %v5827_v38, %v5481_v54 }
 0x8fa   :  { %6151 = vmatmul.mubr.msk.f32.vlgmr.msra.gmra.mrb[38].mxu1 %vm109_vm0, %v5489_v31 }
 0x9cd   :  { %v6152_v46 = vpop.f32.mrb[38].mxu1 }
 0x9ce   :  { %v5579_v26 = vadd.f32 %v6152_v46, %v5828_v19  ;;  %v5573_v16 = vpop.f32.mrb[39].mxu1 }
 0x9cf   :  { %v5574_v59 = vadd.f32 %v5828_v19, %v5573_v16 }
 0x9d0   :  { %v5583_v14 = vmax.f32 %v5579_v26, 0.0 }
 0x9d1   :  { %v5582_v0 = vmax.f32 %v5574_v59, 0.0 }
 0x9d3   :  { %6169 = vmatprep.mubr.msk.f32.mxu0 %vm5599_vm11, %v5582_v0 }
 0x9d4   :  { %6170 = vmatmul.mubr.msk.f32.vlgmr.msra.gmra.mrb[34].mxu0 %vm5599_vm11, %v5583_v14 }
 0xaa7   :  { %v6171_v40 = vpop.f32.mrb[34].mxu0 }
 0xaa8   :  { %v5678_v23 = vadd.f32 %v6171_v40, %v5831_v27  ;;  %v5672_v61 = vpop.f32.mrb[35].mxu0 }
 0xaa9   :  { %v5673_v4 = vadd.f32 %v5831_v27, %v5672_v61 }
 0xaaa   :  { %v5682_v60 = vadd.f32 %v5678_v23, %v7742_v53 }
 0xaab   :  { %v5681_v44 = vadd.f32 %v5673_v4, %v7744_v50 }
 0xaac   :  { %5684 = vst.msk [vmem:[#allocation10 + $0x8] sm:$0xff] %vm109_vm0, %v5682_v60 }
 0xaad   :  { %5683 = vst.msk [vmem:[#allocation10] sm:$0xff] %vm109_vm0, %v5681_v44 }
 0xaae   :  { %6425 = shalt.err (!%p6422_p8)
}
 0xaaf   :  { %s6426_s10 = scalar_lea.hbm %s7825_s14, 256 }
 0xab0   :  { %p6427_p9 = scmp.ne.s32.totalorder %s7825_s14, %s6426_s10  ;;  %p6430_p10 = scmp.lt.u32.totalorder %s6426_s10, %s7825_s14 }
 0xab2   :  { %p6432_p11 = pnand %p6430_p10, %p6427_p9 }
 0xab4   :  { %6435 = shalt.err (!%p6432_p11)
}
 0xab5   :  { %5696 = dma.vmem_to_hbm [thread:$0]  %s5691_s4, 256, %s7825_s14, [#allocation4], %s6446_s25, %s6446_s25, %s6447_s26  }
 0xab6   :  { %6442 = dma.done.wait [#allocation4], 256  }
 0xab7   :  { %6443 = vsyncadd [#allocation4], 4294967040 }
 0xab8   :  { %5700 = vsyncpa [#allocation3], 1 }
 0xab9   :  { %5701 = vsyncpa [#allocation6], 1 }
 0xaba   :  { %5702 = vsyncpa [#allocation9], 1 }
 0xabb   :  { %5703 = vsyncpa [#allocation4], 1 }

</bundles_post_ra>
